<compile_context>
chip_gen: v7x
topology: tpu7x:2x2x1
jax: 0.10.0
libtpu: 0.0.40
codegen_flags: <defaults>
</compile_context>

<pallas_src>
import numpy as np
import jax
import jax.numpy as jnp
from jax import lax
from jax.experimental import pallas as pl
from jax.experimental.pallas import tpu as pltpu

D_PAD = 128  # lane-dense padded d_model


# ----------------------------- Pallas kernel ---------------------------------

def make_llama_block_kernel(M, D, Dp, H, NB):
    inv_sqrt_d = float(1.0 / np.sqrt(D))     # SDPA scales by 1/sqrt(d_model)
    rms_mult = float(np.sqrt(M * D))         # 1/ff_rms == rsqrt(sum x^2) * sqrt(M*D)
    HD = H * Dp
    R = NB * M                               # rows processed per grid step
    SR = NB * H * M                          # rows of the (batch, head)-stacked attn
    NSEG = NB * H                            # number of independent attention segments
    NEG = -1e30

    def kernel(x_ref, scale_ref, wqkv_ref, cos_ref, sin_ref, wo_ref,
               w1_ref, wg_ref, wl_ref, bias_ref, beta_ref, out_ref):
        f32, bf16 = jnp.float32, jnp.bfloat16

        x = x_ref[...]                        # (R, Dp) f32, lanes >= D are zero
        scale = scale_ref[...]                # (R, Dp)

        def rms_norm(z):
            # per-batch-element reduction; padded lanes are zero so each segmented
            # sum equals the unpadded (M, D) reference reduction
            segs = []
            for b in range(NB):
                seg = z[b * M:(b + 1) * M, :]
                inv = lax.rsqrt(jnp.sum(seg * seg)) * rms_mult
                segs.append(seg * inv)
            zn = segs[0] if NB == 1 else jnp.concatenate(segs, axis=0)
            return scale * zn

        x1 = rms_norm(x)

        # ---- fused projection: one (R, Dp) x (Dp, 5*H*Dp) matmul producing
        #      [Q | Q@S | K | K@S | V] (RoPE swap folded into the weights) ----
        qkv = jnp.dot(x1.astype(bf16), wqkv_ref[...],
                      preferred_element_type=f32)          # (R, 5*HD) f32

        cos = cos_ref[...]                    # (R, HD), tiled per head & batch
        sin = sin_ref[...]
        q_rot = qkv[:, 0 * HD:1 * HD] * cos + qkv[:, 1 * HD:2 * HD] * sin
        k_rot = qkv[:, 2 * HD:3 * HD] * cos + qkv[:, 3 * HD:4 * HD] * sin
        v_all = qkv[:, 4 * HD:5 * HD]

        # ---- batched attention over (batch, head): stack heads along sublanes ----
        def stack_heads(t):                   # (R, H*Dp) -> (SR, Dp)
            parts = [t[:, h * Dp:(h + 1) * Dp] for h in range(H)]
            return parts[0] if H == 1 else jnp.concatenate(parts, axis=0)

        q_s = stack_heads(q_rot).astype(bf16)
        k_s = stack_heads(k_rot).astype(bf16)
        v_s = stack_heads(v_all).astype(bf16)

        s = lax.dot_general(q_s, k_s, (((1,), (1,)), ((), ())),
                            preferred_element_type=f32)    # (SR, SR)

        # in-kernel block-diagonal causal mask (segment = one (batch, head) pair)
        ridx = lax.broadcasted_iota(jnp.int32, (SR, SR), 0)
        cidx = lax.broadcasted_iota(jnp.int32, (SR, SR), 1)
        seg_r = jnp.zeros((SR, SR), jnp.int32)
        seg_c = jnp.zeros((SR, SR), jnp.int32)
        for t in range(1, NSEG):              # static, tiny (NSEG - 1 compares/adds)
            seg_r = seg_r + (ridx >= t * M).astype(jnp.int32)
            seg_c = seg_c + (cidx >= t * M).astype(jnp.int32)
        allowed = (seg_r == seg_c) & (cidx <= ridx)

        s = s * inv_sqrt_d + jnp.where(allowed, 0.0, NEG)
        s = s - jnp.max(s, axis=-1, keepdims=True)
        p = jnp.exp(s)
        p = p * pl.reciprocal(jnp.sum(p, axis=-1, keepdims=True), approx=True)

        o_s = jnp.dot(p.astype(bf16), v_s, preferred_element_type=f32)   # (SR, Dp)

        # back to (R, H*Dp): head h occupies rows [h*R, (h+1)*R) of o_s
        if H == 1:
            heads_cat = o_s
        else:
            heads_cat = jnp.concatenate([o_s[h * R:(h + 1) * R, :] for h in range(H)],
                                        axis=1)             # (R, H*Dp)

        b4 = bias_ref[...]                    # (4, Dp): rows = bo, b1, bg, bl
        attn = jnp.dot(heads_cat.astype(bf16), wo_ref[...],
                       preferred_element_type=f32) + b4[0:1, :]

        x2 = x1 + attn                        # matches reference residual structure
        x3 = rms_norm(x2)

        # ---- feedforward: Linear(d,d) -> SwiGLU ----
        y = jnp.dot(x3.astype(bf16), w1_ref[...],
                    preferred_element_type=f32) + b4[1:2, :]
        yb = y.astype(bf16)
        g = jnp.dot(yb, wg_ref[...], preferred_element_type=f32) + b4[2:3, :]
        lin = jnp.dot(yb, wl_ref[...], preferred_element_type=f32) + b4[3:4, :]
        beta = beta_ref[0]                    # scalar read from SMEM
        out_ref[...] = x3 + (g * jax.nn.sigmoid(beta * g)) * lin   # lane-dense store

    return kernel


# ------------------------ parameter packing for the kernel --------------------

def pack_params(p, *, M, D, Dp, H, NB):
    bf16 = jnp.bfloat16

    def pad_sq(w):                                   # (D, D) -> (Dp, Dp)
        return jnp.pad(w, ((0, Dp - D), (0, Dp - D)))

    def pad_row(v):                                  # (1, D) -> (Dp,)
        return jnp.pad(v.reshape(-1), (0, Dp - D))

    # signed swap: (q @ S)[2i] = q[2i+1], (q @ S)[2i+1] = -q[2i]
    swap = np.zeros((D, D), np.float32)
    for i in range(D // 2):
        swap[2 * i + 1, 2 * i] = 1.0
        swap[2 * i, 2 * i + 1] = -1.0
    swap = jnp.asarray(swap)

    def group(ws):                                   # list of (D,D) -> (Dp, H*Dp)
        return jnp.concatenate([pad_sq(w) for w in ws], axis=1)

    wq = [p["wq"][h] for h in range(H)]
    wk = [p["wk"][h] for h in range(H)]
    wv = [p["wv"][h] for h in range(H)]
    wq_s = [w @ swap for w in wq]                    # exact signed column permutation
    wk_s = [w @ swap for w in wk]
    wqkv = jnp.concatenate([group(wq), group(wq_s), group(wk), group(wk_s), group(wv)],
                           axis=1).astype(bf16)      # (Dp, 5*H*Dp)

    wo = jnp.concatenate([pad_sq(p["wo"][h]) for h in range(H)], axis=0).astype(bf16)

    cos_p = jnp.pad(p["cos"], ((0, 0), (0, Dp - D)))
    sin_p = jnp.pad(p["sin"], ((0, 0), (0, Dp - D)))
    cos_t = jnp.tile(cos_p, (NB, H))                 # (NB*M, H*Dp)
    sin_t = jnp.tile(sin_p, (NB, H))
    scale_t = jnp.tile(jnp.pad(p["scale"], ((0, 0), (0, Dp - D))), (NB, 1))

    biases = jnp.stack([pad_row(p["bo"]), pad_row(p["b1"]),
                        pad_row(p["bg"]), pad_row(p["bl"])], axis=0)  # (4, Dp)

    return dict(scale=scale_t, wqkv=wqkv, cos=cos_t, sin=sin_t, wo=wo,
                w1=pad_sq(p["w1"]).astype(bf16), wg=pad_sq(p["wg"]).astype(bf16),
                wl=pad_sq(p["wl"]).astype(bf16), biases=biases,
                beta=p["beta"].astype(jnp.float32))


# ------------------------------- wrapper --------------------------------------

def _batches_per_step(B):
    """Fold the whole batch into one grid step on single-TC chips; keep grid=(B,)
    (sharded across TensorCores via dimension_semantics) on multi-TC/megacore chips."""
    try:
        kind = jax.devices()[0].device_kind.lower()
    except Exception:
        return B
    multi_tc = ("v4" in kind) or ("v7" in kind) or ("v5p" in kind) or (kind.strip() == "tpu v5")
    return 1 if (multi_tc and B > 1) else B


def llama_block(x, params, Dp=D_PAD):
    B, M, D = x.shape
    H = params["wq"].shape[0]
    NB = _batches_per_step(B)                 # batch elements folded per grid step
    R = NB * M
    grid = (B // NB,)

    kp = pack_params(params, M=M, D=D, Dp=Dp, H=H, NB=NB)
    x_p = jnp.pad(x, ((0, 0), (0, 0), (0, Dp - D))).reshape(B * M, Dp)

    def const_spec(shape):
        n = len(shape)
        return pl.BlockSpec(shape, lambda i, _n=n: (0,) * _n)

    in_specs = [
        pl.BlockSpec((R, Dp), lambda i: (i, 0)),            # x rows (padded)
        const_spec((R, Dp)),                                 # RMSNorm scale (tiled)
        const_spec((Dp, 5 * H * Dp)),                        # fused [Q|Q@S|K|K@S|V] (bf16)
        const_spec((R, H * Dp)),                             # cos table (tiled)
        const_spec((R, H * Dp)),                             # sin table (tiled)
        const_spec((H * Dp, Dp)),                            # fused Wo (bf16)
        const_spec((Dp, Dp)),                                # w1 (bf16)
        const_spec((Dp, Dp)),                                # wg (bf16)
        const_spec((Dp, Dp)),                                # wl (bf16)
        const_spec((4, Dp)),                                 # [bo, b1, bg, bl]
        pl.BlockSpec(memory_space=pltpu.MemorySpace.SMEM),   # beta scalar (SMEM)
    ]

    kernel = make_llama_block_kernel(M, D, Dp, H, NB)
    out = pl.pallas_call(
        kernel,
        out_shape=jax.ShapeDtypeStruct((B * M, Dp), jnp.float32),
        grid=grid,
        in_specs=in_specs,
        out_specs=pl.BlockSpec((R, Dp), lambda i: (i, 0)),
        compiler_params=pltpu.CompilerParams(dimension_semantics=("parallel",)),
    )(x_p, kp["scale"], kp["wqkv"], kp["cos"], kp["sin"],
      kp["wo"], kp["w1"], kp["wg"], kp["wl"], kp["biases"], kp["beta"])
    return out.reshape(B, M, Dp)[:, :, :D]


# --------------------------- parameter construction ---------------------------

def make_rotary_tables(M, D):
    pos = np.arange(M, dtype=np.float64)[:, None]
    i = np.arange(D // 2, dtype=np.float64)[None, :]
    theta = 10000.0 ** (-2.0 * (i - 1) / D)          # matches reference's (i - 1)
    ang = pos * theta                                # (M, D//2)
    cos = np.repeat(np.cos(ang), 2, axis=1).astype(np.float32)   # (M, D)
    sin = np.repeat(np.sin(ang), 2, axis=1).astype(np.float32)   # (M, D)
    return jnp.asarray(cos), jnp.asarray(sin)


def init_params(key, context_window, M, D, H):
    ks = jax.random.split(key, 11)
    g = lambda k, shape: 0.05 * jax.random.normal(k, shape, jnp.float32)
    cos, sin = make_rotary_tables(M, D)
    scale_full = jnp.ones((context_window, D), jnp.float32)     # RMSNorm scale (ones)
    return {
        "scale": scale_full[:M, :],
        "wq": g(ks[0], (H, D, D)),
        "wk": g(ks[1], (H, D, D)),
        "wv": g(ks[2], (H, D, D)),
        "cos": cos, "sin": sin,
        "wo": g(ks[3], (H, D, D)),          # per-head chunks of (H*D, D) projection
        "bo": g(ks[4], (1, D)),
        "w1": g(ks[5], (D, D)), "b1": g(ks[6], (1, D)),
        "wg": g(ks[7], (D, D)), "bg": g(ks[8], (1, D)),
        "wl": g(ks[9], (D, D)), "bl": g(ks[10], (1, D)),
        "beta": jnp.ones((1,), jnp.float32),
    }


# ------------------------------ pure-JAX reference ----------------------------
# Mirrors the kernel's bf16-operand / f32-accumulation matmuls so the numeric
# comparison is tight; the math is otherwise the PyTorch module's forward pass.

def llama_block_ref(x, p):
    B, M, D = x.shape
    H = p["wq"].shape[0]
    f32, bf16 = jnp.float32, jnp.bfloat16
    cos, sin = p["cos"], p["sin"]

    def rms(z):
        ff = jnp.sqrt(jnp.sum(z * z, axis=(1, 2), keepdims=True)) * (M * D) ** -0.5
        return p["scale"][None] * (z / ff)

    def rope(t):                                    # t: (B, M, D)
        t_even = t[..., 0::2]
        t_odd = t[..., 1::2]
        swapped = jnp.stack([t_odd, -t_even], axis=-1).reshape(t.shape)
        return t * cos[None] + swapped * sin[None]

    def mm(a, w):                                   # bf16 matmul, f32 accumulation
        return jnp.einsum("bmk,kn->bmn", a.astype(bf16), w.astype(bf16),
                          preferred_element_type=f32)

    x1 = rms(x)
    mask = jnp.tril(jnp.ones((M, M), bool))
    heads = []
    for h in range(H):
        q = rope(mm(x1, p["wq"][h])).astype(bf16)
        k = rope(mm(x1, p["wk"][h])).astype(bf16)
        v = mm(x1, p["wv"][h]).astype(bf16)
        s = jnp.einsum("bmd,bnd->bmn", q, k,
                       preferred_element_type=f32) / jnp.sqrt(jnp.float32(D))
        s = jnp.where(mask[None], s, -1e30)
        a = jax.nn.softmax(s, axis=-1)
        heads.append(jnp.einsum("bmn,bnd->bmd", a.astype(bf16), v,
                                preferred_element_type=f32))
    cat = jnp.concatenate(heads, axis=-1)                        # (B, M, H*D)
    wo_cat = jnp.concatenate([p["wo"][h] for h in range(H)], axis=0)
    attn = mm(cat, wo_cat) + p["bo"][None]
    x2 = x1 + attn
    x3 = rms(x2)
    y = mm(x3, p["w1"]) + p["b1"][None]
    g = mm(y, p["wg"]) + p["bg"][None]
    lin = mm(y, p["wl"]) + p["bl"][None]
    sw = g * jax.nn.sigmoid(p["beta"][0] * g)
    return x3 + sw * lin


# ----------------------------------- main --------------------------------------

if __name__ == "__main__":
    B, M, D, H = 2, 8, 32, 2
    context_window = 8                     # seq_len == context_window

    key = jax.random.PRNGKey(0)
    k_x, k_p = jax.random.split(key)
    x = jax.random.normal(k_x, (B, M, D), jnp.float32)
    params = init_params(k_p, context_window, M, D, H)

    out = jax.block_until_ready(llama_block(x, params))
    ref = llama_block_ref(x, params)

    assert out.shape == (B, M, D)
    np.testing.assert_allclose(np.asarray(out), np.asarray(ref), rtol=1e-2, atol=1e-2)

    print("KERNEL_OK")
</pallas_src>

<mosaic_0001>
module attributes {stable_mosaic.version = 11 : i64} {
  func.func @kernel(%arg0: i32, %arg1: memref<16x128xf32, #tpu.memory_space<vmem>>, %arg2: memref<16x128xf32, #tpu.memory_space<vmem>>, %arg3: memref<128x1280xbf16, #tpu.memory_space<vmem>>, %arg4: memref<16x256xf32, #tpu.memory_space<vmem>>, %arg5: memref<16x256xf32, #tpu.memory_space<vmem>>, %arg6: memref<256x128xbf16, #tpu.memory_space<vmem>>, %arg7: memref<128x128xbf16, #tpu.memory_space<vmem>>, %arg8: memref<128x128xbf16, #tpu.memory_space<vmem>>, %arg9: memref<128x128xbf16, #tpu.memory_space<vmem>>, %arg10: memref<4x128xf32, #tpu.memory_space<vmem>>, %arg11: memref<1xf32, #tpu.memory_space<smem>>, %arg12: memref<16x128xf32, #tpu.memory_space<vmem>>) attributes {dimension_semantics = [#tpu.dimension_semantics<parallel>], iteration_bounds = array<i64: 1>, scalar_prefetch = 0 : i64, scratch_operands = 0 : i64, tpu.core_type = #tpu.core_type<tc>, window_params = [{transform_indices = @transform_0, window_bounds = array<i64: 16, 128>}, {pipeline_mode = #tpu.pipeline_mode<synchronous>, transform_indices = @transform_1, window_bounds = array<i64: 16, 128>}, {pipeline_mode = #tpu.pipeline_mode<synchronous>, transform_indices = @transform_2, window_bounds = array<i64: 128, 1280>}, {pipeline_mode = #tpu.pipeline_mode<synchronous>, transform_indices = @transform_3, window_bounds = array<i64: 16, 256>}, {pipeline_mode = #tpu.pipeline_mode<synchronous>, transform_indices = @transform_4, window_bounds = array<i64: 16, 256>}, {pipeline_mode = #tpu.pipeline_mode<synchronous>, transform_indices = @transform_5, window_bounds = array<i64: 256, 128>}, {pipeline_mode = #tpu.pipeline_mode<synchronous>, transform_indices = @transform_6, window_bounds = array<i64: 128, 128>}, {pipeline_mode = #tpu.pipeline_mode<synchronous>, transform_indices = @transform_7, window_bounds = array<i64: 128, 128>}, {pipeline_mode = #tpu.pipeline_mode<synchronous>, transform_indices = @transform_8, window_bounds = array<i64: 128, 128>}, {pipeline_mode = #tpu.pipeline_mode<synchronous>, transform_indices = @transform_9, window_bounds = array<i64: 4, 128>}, {transform_indices = @transform_10, window_bounds = array<i64: 1>}, {transform_indices = @transform_11, window_bounds = array<i64: 16, 128>}]} {
    %c0 = arith.constant 0 : index
    %c0_0 = arith.constant 0 : index
    %0 = vector.load %arg1[%c0, %c0_0] : memref<16x128xf32, #tpu.memory_space<vmem>>, vector<16x128xf32>
    %c0_1 = arith.constant 0 : index
    %c0_2 = arith.constant 0 : index
    %1 = vector.load %arg2[%c0_1, %c0_2] : memref<16x128xf32, #tpu.memory_space<vmem>>, vector<16x128xf32>
    %2 = vector.extract_strided_slice %0 {offsets = [0, 0], sizes = [8, 128], strides = [1, 1]} : vector<16x128xf32> to vector<8x128xf32>
    %3 = arith.mulf %2, %2 : vector<8x128xf32>
    %4 = vector.shape_cast %3 : vector<8x128xf32> to vector<1x8x128xf32>
    %cst = arith.constant dense<0.000000e+00> : vector<1xf32>
    %5 = vector.multi_reduction <add>, %4, %cst [1, 2] : vector<1x8x128xf32> to vector<1xf32>
    %6 = vector.shape_cast %5 : vector<1xf32> to vector<1x1x1xf32>
    %7 = vector.extract %6[0, 0, 0] : f32 from vector<1x1x1xf32>
    %8 = math.rsqrt %7 : f32
    %cst_3 = arith.constant 1.600000e+01 : f32
    %9 = arith.mulf %8, %cst_3 : f32
    %10 = vector.broadcast %9 : f32 to vector<8x128xf32>
    %11 = arith.mulf %2, %10 : vector<8x128xf32>
    %12 = vector.extract_strided_slice %0 {offsets = [8, 0], sizes = [8, 128], strides = [1, 1]} : vector<16x128xf32> to vector<8x128xf32>
    %13 = arith.mulf %12, %12 : vector<8x128xf32>
    %14 = vector.shape_cast %13 : vector<8x128xf32> to vector<1x8x128xf32>
    %cst_4 = arith.constant dense<0.000000e+00> : vector<1xf32>
    %15 = vector.multi_reduction <add>, %14, %cst_4 [1, 2] : vector<1x8x128xf32> to vector<1xf32>
    %16 = vector.shape_cast %15 : vector<1xf32> to vector<1x1x1xf32>
    %17 = vector.extract %16[0, 0, 0] : f32 from vector<1x1x1xf32>
    %18 = math.rsqrt %17 : f32
    %cst_5 = arith.constant 1.600000e+01 : f32
    %19 = arith.mulf %18, %cst_5 : f32
    %20 = vector.broadcast %19 : f32 to vector<8x128xf32>
    %21 = arith.mulf %12, %20 : vector<8x128xf32>
    %22 = tpu.concatenate %11, %21 in 0 : vector<8x128xf32>, vector<8x128xf32> -> vector<16x128xf32>
    %23 = arith.mulf %1, %22 : vector<16x128xf32>
    %24 = arith.truncf %23 : vector<16x128xf32> to vector<16x128xbf16>
    %c0_6 = arith.constant 0 : index
    %c0_7 = arith.constant 0 : index
    %25 = vector.load %arg3[%c0_6, %c0_7] : memref<128x1280xbf16, #tpu.memory_space<vmem>>, vector<128x1280xbf16>
    %cst_8 = arith.constant dense<0.000000e+00> : vector<16x1280xf32>
    %26 = tpu.matmul %24, %25, %cst_8 {dimension_numbers = #tpu.dot_dimension_numbers<[1], [0], [0], [1], [0, 0, 1, 1], [], []>} : vector<16x128xbf16>, vector<128x1280xbf16>, vector<16x1280xf32> -> vector<16x1280xf32>
    %c0_9 = arith.constant 0 : index
    %c0_10 = arith.constant 0 : index
    %27 = vector.load %arg4[%c0_9, %c0_10] : memref<16x256xf32, #tpu.memory_space<vmem>>, vector<16x256xf32>
    %c0_11 = arith.constant 0 : index
    %c0_12 = arith.constant 0 : index
    %28 = vector.load %arg5[%c0_11, %c0_12] : memref<16x256xf32, #tpu.memory_space<vmem>>, vector<16x256xf32>
    %29 = vector.extract_strided_slice %26 {offsets = [0, 0], sizes = [16, 256], strides = [1, 1]} : vector<16x1280xf32> to vector<16x256xf32>
    %30 = arith.mulf %29, %27 : vector<16x256xf32>
    %31 = vector.extract_strided_slice %26 {offsets = [0, 256], sizes = [16, 256], strides = [1, 1]} : vector<16x1280xf32> to vector<16x256xf32>
    %32 = arith.mulf %31, %28 : vector<16x256xf32>
    %33 = arith.addf %30, %32 : vector<16x256xf32>
    %34 = vector.extract_strided_slice %26 {offsets = [0, 512], sizes = [16, 256], strides = [1, 1]} : vector<16x1280xf32> to vector<16x256xf32>
    %35 = arith.mulf %34, %27 : vector<16x256xf32>
    %36 = vector.extract_strided_slice %26 {offsets = [0, 768], sizes = [16, 256], strides = [1, 1]} : vector<16x1280xf32> to vector<16x256xf32>
    %37 = arith.mulf %36, %28 : vector<16x256xf32>
    %38 = arith.addf %35, %37 : vector<16x256xf32>
    %39 = vector.extract_strided_slice %26 {offsets = [0, 1024], sizes = [16, 256], strides = [1, 1]} : vector<16x1280xf32> to vector<16x256xf32>
    %40 = vector.extract_strided_slice %33 {offsets = [0, 0], sizes = [16, 128], strides = [1, 1]} : vector<16x256xf32> to vector<16x128xf32>
    %41 = vector.extract_strided_slice %33 {offsets = [0, 128], sizes = [16, 128], strides = [1, 1]} : vector<16x256xf32> to vector<16x128xf32>
    %42 = tpu.concatenate %40, %41 in 0 : vector<16x128xf32>, vector<16x128xf32> -> vector<32x128xf32>
    %43 = arith.truncf %42 : vector<32x128xf32> to vector<32x128xbf16>
    %44 = vector.extract_strided_slice %38 {offsets = [0, 0], sizes = [16, 128], strides = [1, 1]} : vector<16x256xf32> to vector<16x128xf32>
    %45 = vector.extract_strided_slice %38 {offsets = [0, 128], sizes = [16, 128], strides = [1, 1]} : vector<16x256xf32> to vector<16x128xf32>
    %46 = tpu.concatenate %44, %45 in 0 : vector<16x128xf32>, vector<16x128xf32> -> vector<32x128xf32>
    %47 = arith.truncf %46 : vector<32x128xf32> to vector<32x128xbf16>
    %48 = vector.extract_strided_slice %39 {offsets = [0, 0], sizes = [16, 128], strides = [1, 1]} : vector<16x256xf32> to vector<16x128xf32>
    %49 = vector.extract_strided_slice %39 {offsets = [0, 128], sizes = [16, 128], strides = [1, 1]} : vector<16x256xf32> to vector<16x128xf32>
    %50 = tpu.concatenate %48, %49 in 0 : vector<16x128xf32>, vector<16x128xf32> -> vector<32x128xf32>
    %51 = arith.truncf %50 : vector<32x128xf32> to vector<32x128xbf16>
    %cst_13 = arith.constant dense<0.000000e+00> : vector<32x32xf32>
    %52 = tpu.matmul %43, %47, %cst_13 {dimension_numbers = #tpu.dot_dimension_numbers<[1], [1], [0], [0], [0, 0, 1, 0], [], []>} : vector<32x128xbf16>, vector<32x128xbf16>, vector<32x32xf32> -> vector<32x32xf32>
    %53 = tpu.iota {dimensions = array<i32: 0>} : vector<32x32xi32>
    %54 = tpu.iota {dimensions = array<i32: 1>} : vector<32x32xi32>
    %c0_i32 = arith.constant 0 : i32
    %55 = vector.broadcast %c0_i32 : i32 to vector<32x32xi32>
    %c0_i32_14 = arith.constant 0 : i32
    %56 = vector.broadcast %c0_i32_14 : i32 to vector<32x32xi32>
    %c8_i32 = arith.constant 8 : i32
    %57 = vector.broadcast %c8_i32 : i32 to vector<32x32xi32>
    %58 = arith.cmpi sge, %53, %57 : vector<32x32xi32>
    %59 = arith.extui %58 : vector<32x32xi1> to vector<32x32xi32>
    %60 = arith.addi %55, %59 : vector<32x32xi32>
    %c8_i32_15 = arith.constant 8 : i32
    %61 = vector.broadcast %c8_i32_15 : i32 to vector<32x32xi32>
    %62 = arith.cmpi sge, %54, %61 : vector<32x32xi32>
    %63 = arith.extui %62 : vector<32x32xi1> to vector<32x32xi32>
    %64 = arith.addi %56, %63 : vector<32x32xi32>
    %c16_i32 = arith.constant 16 : i32
    %65 = vector.broadcast %c16_i32 : i32 to vector<32x32xi32>
    %66 = arith.cmpi sge, %53, %65 : vector<32x32xi32>
    %67 = arith.extui %66 : vector<32x32xi1> to vector<32x32xi32>
    %68 = arith.addi %60, %67 : vector<32x32xi32>
    %c16_i32_16 = arith.constant 16 : i32
    %69 = vector.broadcast %c16_i32_16 : i32 to vector<32x32xi32>
    %70 = arith.cmpi sge, %54, %69 : vector<32x32xi32>
    %71 = arith.extui %70 : vector<32x32xi1> to vector<32x32xi32>
    %72 = arith.addi %64, %71 : vector<32x32xi32>
    %c24_i32 = arith.constant 24 : i32
    %73 = vector.broadcast %c24_i32 : i32 to vector<32x32xi32>
    %74 = arith.cmpi sge, %53, %73 : vector<32x32xi32>
    %75 = arith.extui %74 : vector<32x32xi1> to vector<32x32xi32>
    %76 = arith.addi %68, %75 : vector<32x32xi32>
    %c24_i32_17 = arith.constant 24 : i32
    %77 = vector.broadcast %c24_i32_17 : i32 to vector<32x32xi32>
    %78 = arith.cmpi sge, %54, %77 : vector<32x32xi32>
    %79 = arith.extui %78 : vector<32x32xi1> to vector<32x32xi32>
    %80 = arith.addi %72, %79 : vector<32x32xi32>
    %81 = arith.cmpi eq, %76, %80 : vector<32x32xi32>
    %82 = arith.cmpi sle, %54, %53 : vector<32x32xi32>
    %83 = arith.andi %81, %82 : vector<32x32xi1>
    %cst_18 = arith.constant 0.176776692 : f32
    %84 = vector.broadcast %cst_18 : f32 to vector<32x32xf32>
    %85 = arith.mulf %52, %84 : vector<32x32xf32>
    %cst_19 = arith.constant 0.000000e+00 : f32
    %cst_20 = arith.constant -1.000000e+30 : f32
    %86 = vector.broadcast %cst_19 : f32 to vector<32x32xf32>
    %87 = vector.broadcast %cst_20 : f32 to vector<32x32xf32>
    %88 = arith.select %83, %86, %87 : vector<32x32xi1>, vector<32x32xf32>
    %89 = arith.addf %85, %88 : vector<32x32xf32>
    %cst_21 = arith.constant dense<0xFF800000> : vector<32xf32>
    %90 = vector.multi_reduction <maximumf>, %89, %cst_21 [1] : vector<32x32xf32> to vector<32xf32>
    %91 = vector.shape_cast %90 : vector<32xf32> to vector<32x1xf32>
    %92 = vector.broadcast %91 : vector<32x1xf32> to vector<32x32xf32>
    %93 = arith.subf %89, %92 : vector<32x32xf32>
    %94 = math.exp %93 : vector<32x32xf32>
    %cst_22 = arith.constant dense<0.000000e+00> : vector<32xf32>
    %95 = vector.multi_reduction <add>, %94, %cst_22 [1] : vector<32x32xf32> to vector<32xf32>
    %96 = vector.shape_cast %95 : vector<32xf32> to vector<32x1xf32>
    %97 = tpu.reciprocal %96 {approx = true} : vector<32x1xf32> -> vector<32x1xf32>
    %98 = vector.broadcast %97 : vector<32x1xf32> to vector<32x32xf32>
    %99 = arith.mulf %94, %98 : vector<32x32xf32>
    %100 = arith.truncf %99 : vector<32x32xf32> to vector<32x32xbf16>
    %cst_23 = arith.constant dense<0.000000e+00> : vector<32x128xf32>
    %101 = tpu.matmul %100, %51, %cst_23 {dimension_numbers = #tpu.dot_dimension_numbers<[1], [0], [0], [1], [0, 0, 1, 1], [], []>} : vector<32x32xbf16>, vector<32x128xbf16>, vector<32x128xf32> -> vector<32x128xf32>
    %102 = vector.extract_strided_slice %101 {offsets = [0, 0], sizes = [16, 128], strides = [1, 1]} : vector<32x128xf32> to vector<16x128xf32>
    %103 = vector.extract_strided_slice %101 {offsets = [16, 0], sizes = [16, 128], strides = [1, 1]} : vector<32x128xf32> to vector<16x128xf32>
    %104 = tpu.concatenate %102, %103 in 1 : vector<16x128xf32>, vector<16x128xf32> -> vector<16x256xf32>
    %c0_24 = arith.constant 0 : index
    %c0_25 = arith.constant 0 : index
    %105 = vector.load %arg10[%c0_24, %c0_25] : memref<4x128xf32, #tpu.memory_space<vmem>>, vector<4x128xf32>
    %106 = arith.truncf %104 : vector<16x256xf32> to vector<16x256xbf16>
    %c0_26 = arith.constant 0 : index
    %c0_27 = arith.constant 0 : index
    %107 = vector.load %arg6[%c0_26, %c0_27] : memref<256x128xbf16, #tpu.memory_space<vmem>>, vector<256x128xbf16>
    %cst_28 = arith.constant dense<0.000000e+00> : vector<16x128xf32>
    %108 = tpu.matmul %106, %107, %cst_28 {dimension_numbers = #tpu.dot_dimension_numbers<[1], [0], [0], [1], [0, 0, 1, 1], [], []>} : vector<16x256xbf16>, vector<256x128xbf16>, vector<16x128xf32> -> vector<16x128xf32>
    %109 = vector.extract_strided_slice %105 {offsets = [0, 0], sizes = [1, 128], strides = [1, 1]} : vector<4x128xf32> to vector<1x128xf32>
    %110 = vector.broadcast %109 : vector<1x128xf32> to vector<16x128xf32>
    %111 = arith.addf %108, %110 : vector<16x128xf32>
    %112 = arith.addf %23, %111 : vector<16x128xf32>
    %113 = vector.extract_strided_slice %112 {offsets = [0, 0], sizes = [8, 128], strides = [1, 1]} : vector<16x128xf32> to vector<8x128xf32>
    %114 = arith.mulf %113, %113 : vector<8x128xf32>
    %115 = vector.shape_cast %114 : vector<8x128xf32> to vector<1x8x128xf32>
    %cst_29 = arith.constant dense<0.000000e+00> : vector<1xf32>
    %116 = vector.multi_reduction <add>, %115, %cst_29 [1, 2] : vector<1x8x128xf32> to vector<1xf32>
    %117 = vector.shape_cast %116 : vector<1xf32> to vector<1x1x1xf32>
    %118 = vector.extract %117[0, 0, 0] : f32 from vector<1x1x1xf32>
    %119 = math.rsqrt %118 : f32
    %cst_30 = arith.constant 1.600000e+01 : f32
    %120 = arith.mulf %119, %cst_30 : f32
    %121 = vector.broadcast %120 : f32 to vector<8x128xf32>
    %122 = arith.mulf %113, %121 : vector<8x128xf32>
    %123 = vector.extract_strided_slice %112 {offsets = [8, 0], sizes = [8, 128], strides = [1, 1]} : vector<16x128xf32> to vector<8x128xf32>
    %124 = arith.mulf %123, %123 : vector<8x128xf32>
    %125 = vector.shape_cast %124 : vector<8x128xf32> to vector<1x8x128xf32>
    %cst_31 = arith.constant dense<0.000000e+00> : vector<1xf32>
    %126 = vector.multi_reduction <add>, %125, %cst_31 [1, 2] : vector<1x8x128xf32> to vector<1xf32>
    %127 = vector.shape_cast %126 : vector<1xf32> to vector<1x1x1xf32>
    %128 = vector.extract %127[0, 0, 0] : f32 from vector<1x1x1xf32>
    %129 = math.rsqrt %128 : f32
    %cst_32 = arith.constant 1.600000e+01 : f32
    %130 = arith.mulf %129, %cst_32 : f32
    %131 = vector.broadcast %130 : f32 to vector<8x128xf32>
    %132 = arith.mulf %123, %131 : vector<8x128xf32>
    %133 = tpu.concatenate %122, %132 in 0 : vector<8x128xf32>, vector<8x128xf32> -> vector<16x128xf32>
    %134 = arith.mulf %1, %133 : vector<16x128xf32>
    %135 = arith.truncf %134 : vector<16x128xf32> to vector<16x128xbf16>
    %c0_33 = arith.constant 0 : index
    %c0_34 = arith.constant 0 : index
    %136 = vector.load %arg7[%c0_33, %c0_34] : memref<128x128xbf16, #tpu.memory_space<vmem>>, vector<128x128xbf16>
    %cst_35 = arith.constant dense<0.000000e+00> : vector<16x128xf32>
    %137 = tpu.matmul %135, %136, %cst_35 {dimension_numbers = #tpu.dot_dimension_numbers<[1], [0], [0], [1], [0, 0, 1, 1], [], []>} : vector<16x128xbf16>, vector<128x128xbf16>, vector<16x128xf32> -> vector<16x128xf32>
    %138 = vector.extract_strided_slice %105 {offsets = [1, 0], sizes = [1, 128], strides = [1, 1]} : vector<4x128xf32> to vector<1x128xf32>
    %139 = vector.broadcast %138 : vector<1x128xf32> to vector<16x128xf32>
    %140 = arith.addf %137, %139 : vector<16x128xf32>
    %141 = arith.truncf %140 : vector<16x128xf32> to vector<16x128xbf16>
    %c0_36 = arith.constant 0 : index
    %c0_37 = arith.constant 0 : index
    %142 = vector.load %arg8[%c0_36, %c0_37] : memref<128x128xbf16, #tpu.memory_space<vmem>>, vector<128x128xbf16>
    %cst_38 = arith.constant dense<0.000000e+00> : vector<16x128xf32>
    %143 = tpu.matmul %141, %142, %cst_38 {dimension_numbers = #tpu.dot_dimension_numbers<[1], [0], [0], [1], [0, 0, 1, 1], [], []>} : vector<16x128xbf16>, vector<128x128xbf16>, vector<16x128xf32> -> vector<16x128xf32>
    %144 = vector.extract_strided_slice %105 {offsets = [2, 0], sizes = [1, 128], strides = [1, 1]} : vector<4x128xf32> to vector<1x128xf32>
    %145 = vector.broadcast %144 : vector<1x128xf32> to vector<16x128xf32>
    %146 = arith.addf %143, %145 : vector<16x128xf32>
    %c0_39 = arith.constant 0 : index
    %c0_40 = arith.constant 0 : index
    %147 = vector.load %arg9[%c0_39, %c0_40] : memref<128x128xbf16, #tpu.memory_space<vmem>>, vector<128x128xbf16>
    %cst_41 = arith.constant dense<0.000000e+00> : vector<16x128xf32>
    %148 = tpu.matmul %141, %147, %cst_41 {dimension_numbers = #tpu.dot_dimension_numbers<[1], [0], [0], [1], [0, 0, 1, 1], [], []>} : vector<16x128xbf16>, vector<128x128xbf16>, vector<16x128xf32> -> vector<16x128xf32>
    %149 = vector.extract_strided_slice %105 {offsets = [3, 0], sizes = [1, 128], strides = [1, 1]} : vector<4x128xf32> to vector<1x128xf32>
    %150 = vector.broadcast %149 : vector<1x128xf32> to vector<16x128xf32>
    %151 = arith.addf %148, %150 : vector<16x128xf32>
    %c0_42 = arith.constant 0 : index
    %152 = memref.load %arg11[%c0_42] : memref<1xf32, #tpu.memory_space<smem>>
    %153 = vector.broadcast %152 : f32 to vector<16x128xf32>
    %154 = arith.mulf %153, %146 : vector<16x128xf32>
    %155 = arith.negf %154 : vector<16x128xf32>
    %156 = math.exp %155 : vector<16x128xf32>
    %cst_43 = arith.constant 1.000000e+00 : f32
    %157 = vector.broadcast %cst_43 : f32 to vector<16x128xf32>
    %158 = arith.addf %157, %156 : vector<16x128xf32>
    %159 = arith.divf %157, %158 : vector<16x128xf32>
    %160 = arith.mulf %146, %159 : vector<16x128xf32>
    %161 = arith.mulf %160, %151 : vector<16x128xf32>
    %162 = arith.addf %134, %161 : vector<16x128xf32>
    %c0_44 = arith.constant 0 : index
    %c0_45 = arith.constant 0 : index
    %163 = vector.load %arg12[%c0_44, %c0_45] : memref<16x128xf32, #tpu.memory_space<vmem>>, vector<16x128xf32>
    tpu.vector_store %arg12[%c0_44, %c0_45], %162 {strides = array<i32>} : memref<16x128xf32, #tpu.memory_space<vmem>>, vector<16x128xf32>,
    return
  }
  func.func @transform_0(%arg0: i32) -> (i32, i32) {
    %c0_i32 = arith.constant 0 : i32
    %c0_i32_0 = arith.constant 0 : i32
    return %arg0, %c0_i32 : i32, i32
  }
  func.func @transform_1(%arg0: i32) -> (i32, i32) {
    %c0_i32 = arith.constant 0 : i32
    %c0_i32_0 = arith.constant 0 : i32
    %c0_i32_1 = arith.constant 0 : i32
    return %c0_i32, %c0_i32_0 : i32, i32
  }
  func.func @transform_2(%arg0: i32) -> (i32, i32) {
    %c0_i32 = arith.constant 0 : i32
    %c0_i32_0 = arith.constant 0 : i32
    %c0_i32_1 = arith.constant 0 : i32
    return %c0_i32, %c0_i32_0 : i32, i32
  }
  func.func @transform_3(%arg0: i32) -> (i32, i32) {
    %c0_i32 = arith.constant 0 : i32
    %c0_i32_0 = arith.constant 0 : i32
    %c0_i32_1 = arith.constant 0 : i32
    return %c0_i32, %c0_i32_0 : i32, i32
  }
  func.func @transform_4(%arg0: i32) -> (i32, i32) {
    %c0_i32 = arith.constant 0 : i32
    %c0_i32_0 = arith.constant 0 : i32
    %c0_i32_1 = arith.constant 0 : i32
    return %c0_i32, %c0_i32_0 : i32, i32
  }
  func.func @transform_5(%arg0: i32) -> (i32, i32) {
    %c0_i32 = arith.constant 0 : i32
    %c0_i32_0 = arith.constant 0 : i32
    %c0_i32_1 = arith.constant 0 : i32
    return %c0_i32, %c0_i32_0 : i32, i32
  }
  func.func @transform_6(%arg0: i32) -> (i32, i32) {
    %c0_i32 = arith.constant 0 : i32
    %c0_i32_0 = arith.constant 0 : i32
    %c0_i32_1 = arith.constant 0 : i32
    return %c0_i32, %c0_i32_0 : i32, i32
  }
  func.func @transform_7(%arg0: i32) -> (i32, i32) {
    %c0_i32 = arith.constant 0 : i32
    %c0_i32_0 = arith.constant 0 : i32
    %c0_i32_1 = arith.constant 0 : i32
    return %c0_i32, %c0_i32_0 : i32, i32
  }
  func.func @transform_8(%arg0: i32) -> (i32, i32) {
    %c0_i32 = arith.constant 0 : i32
    %c0_i32_0 = arith.constant 0 : i32
    %c0_i32_1 = arith.constant 0 : i32
    return %c0_i32, %c0_i32_0 : i32, i32
  }
  func.func @transform_9(%arg0: i32) -> (i32, i32) {
    %c0_i32 = arith.constant 0 : i32
    %c0_i32_0 = arith.constant 0 : i32
    %c0_i32_1 = arith.constant 0 : i32
    return %c0_i32, %c0_i32_0 : i32, i32
  }
  func.func @transform_10(%arg0: i32) -> i32 {
    %c0_i32 = arith.constant 0 : i32
    %c0_i32_0 = arith.constant 0 : i32
    return %c0_i32 : i32
  }
  func.func @transform_11(%arg0: i32) -> (i32, i32) {
    %c0_i32 = arith.constant 0 : i32
    %c0_i32_0 = arith.constant 0 : i32
    return %arg0, %c0_i32 : i32, i32
  }
}

</mosaic_0001>

<bundles_post_ra>
// kernel: tpu_custom_call.1
= control target key start
LH: loop header
LB: loop body
LE: loop exit
PB: predicated region body
PF: predicated region fallthrough
CT: control target
= control target key end

     0   :  { %17 = vsyncpa [#allocation4], 0  ;;  %s2830_s0 = inlined_call_operand.hbm [shape: f32[16,128], index: 0, kind: input, shape index: {}]   ;;  %s2831_s1 = inlined_call_operand.hbm [shape: f32[16,128], index: 1, kind: input, shape index: {}]   ;;  %s2832_s2 = inlined_call_operand.hbm [shape: bf16[128,1280], index: 2, kind: input, shape index: {}]   ;;  %s2833_s3 = inlined_call_operand.hbm [shape: f32[16,256], index: 3, kind: input, shape index: {}]   ;;  %s2834_s4 = inlined_call_operand.hbm [shape: f32[16,256], index: 4, kind: input, shape index: {}]   ;;  %s2835_s5 = inlined_call_operand.hbm [shape: bf16[256,128], index: 5, kind: input, shape index: {}]   ;;  %s2836_s6 = inlined_call_operand.hbm [shape: bf16[128,128], index: 6, kind: input, shape index: {}]   ;;  %s2837_s7 = inlined_call_operand.hbm [shape: bf16[128,128], index: 7, kind: input, shape index: {}]   ;;  %s2838_s8 = inlined_call_operand.hbm [shape: bf16[128,128], index: 8, kind: input, shape index: {}]   ;;  %s2839_s9 = inlined_call_operand.vmem [shape: f32[4,128], index: 9, kind: input, shape index: {}]   ;;  %s2840_s10 = inlined_call_operand.<no memory space> [shape: f32[1], index: 10, kind: input, shape index: {}]   ;;  %s2841_s11 = inlined_call_operand.hbm [shape: f32[16,128], index: 11, kind: output, shape index: {}]  }
   0x1   :  { %18 = vsyncpa [#allocation7], 0 }
   0x2   :  { %19 = vsyncpa [#allocation10], 0 }
   0x3   :  { %20 = vsyncpa [#allocation13], 0 }
   0x4   :  { %21 = vsyncpa [#allocation16], 0 }
   0x5   :  { %22 = vsyncpa [#allocation5], 0  ;;  %s2466_s17 = smov [#allocation6]   ;;  %s2467_s19 = smov [#allocation9]  }
   0x6   :  { %s40_s18 = sshll.u32 %s2466_s17, 4  ;;  %s64_s20 = sshll.u32 %s2467_s19, 4  ;;  %s41_s18 = int_to_ptr.vmem [resolvable:$true] %s40_s18  ;;  %s2548_s20 = int_to_ptr.vmem [resolvable:$true] %s64_s20 }
   0x7   :  { %s2234_s23 = scalar_lea.hbm %s2831_s1, 256 }
   0x8   :  { %p2235_p0 = scmp.ne.s32.totalorder %s2831_s1, %s2234_s23  ;;  %p2238_p1 = scmp.lt.u32.totalorder %s2234_s23, %s2831_s1 }
   0xa   :  { %p2240_p2 = pnand %p2238_p1, %p2235_p0 }
   0xc   :  { %2243 = shalt.err (!%p2240_p2)
}
   0xd   :  { %s2244_s28 = scalar_lea.vmem %s41_s18, 256  ;;  %p2249_p4 = scmp.lt.s32.totalorder %s41_s18, %s41_s18 }
   0xe   :  { %p2245_p3 = scmp.ne.s32.totalorder %s41_s18, %s2244_s28  ;;  %p2250_p5 = scmp.lt.s32.totalorder %s2244_s28, %s2244_s28 }
  0x10   :  { %p2251_p6 = por %p2250_p5, %p2249_p4 }
  0x12   :  { %p2252_p7 = pnand %p2251_p6, %p2245_p3 }
  0x14   :  { %2255 = shalt.err (!%p2252_p7)
}
  0x15   :  { %s2468_s29 = smov 128   ;;  %s2469_s30 = smov 8  }
  0x16   :  { %46 = dma.hbm_to_vmem [thread:$0]  %s2831_s1, 256, %s41_s18, [#allocation7], %s2468_s29, %s2468_s29, %s2469_s30  }
  0x17   :  { %s2256_s16 = scalar_lea.hbm %s2833_s3, 512 }
  0x18   :  { %p2257_p8 = scmp.ne.s32.totalorder %s2833_s3, %s2256_s16  ;;  %p2260_p9 = scmp.lt.u32.totalorder %s2256_s16, %s2833_s3 }
  0x1a   :  { %p2262_p10 = pnand %p2260_p9, %p2257_p8 }
  0x1c   :  { %2265 = shalt.err (!%p2262_p10)
}
  0x1d   :  { %s2266_s23 = scalar_lea.vmem %s2548_s20, 512  ;;  %p2271_p12 = scmp.lt.s32.totalorder %s2548_s20, %s2548_s20 }
  0x1e   :  { %p2267_p11 = scmp.ne.s32.totalorder %s2548_s20, %s2266_s23  ;;  %p2272_p13 = scmp.lt.s32.totalorder %s2266_s23, %s2266_s23 }
  0x20   :  { %p2273_p0 = por %p2272_p13, %p2271_p12 }
  0x22   :  { %p2274_p1 = pnand %p2273_p0, %p2267_p11 }
  0x24   :  { %2277 = shalt.err (!%p2274_p1)
}
  0x25   :  { %s2470_s1 = smov 256   ;;  %s2471_s18 = smov 16  }
  0x26   :  { %70 = dma.hbm_to_vmem [thread:$0]  %s2833_s3, 512, %s2548_s20, [#allocation10], %s2470_s1, %s2470_s1, %s2471_s18  }
  0x27   :  { %s2472_s26 = smov [#allocation12]   ;;  %s2278_s13 = scalar_lea.hbm %s2835_s5, 2048 }
  0x28   :  { %s88_s27 = sshll.u32 %s2472_s26, 4  ;;  %p2279_p2 = scmp.ne.s32.totalorder %s2835_s5, %s2278_s13  ;;  %s89_s27 = int_to_ptr.vmem [resolvable:$true] %s88_s27 }
  0x29   :  { %p2282_p3 = scmp.lt.u32.totalorder %s2278_s13, %s2835_s5 }
  0x2b   :  { %p2284_p4 = pnand %p2282_p3, %p2279_p2 }
  0x2d   :  { %2287 = shalt.err (!%p2284_p4)
}
  0x2e   :  { %s2288_s19 = scalar_lea.vmem %s89_s27, 2048  ;;  %p2293_p6 = scmp.lt.s32.totalorder %s89_s27, %s89_s27 }
  0x2f   :  { %p2289_p5 = scmp.ne.s32.totalorder %s89_s27, %s2288_s19  ;;  %p2294_p7 = scmp.lt.s32.totalorder %s2288_s19, %s2288_s19 }
  0x31   :  { %p2295_p8 = por %p2294_p7, %p2293_p6 }
  0x33   :  { %p2296_p9 = pnand %p2295_p8, %p2289_p5 }
  0x35   :  { %2299 = shalt.err (!%p2296_p9)
}
  0x36   :  { %s2473_s3 = smov 64   ;;  %s2474_s20 = smov 4  }
  0x37   :  { %94 = dma.hbm_to_vmem [thread:$0]  %s2835_s5, 2048, %s89_s27, [#allocation13], %s2473_s3, %s2473_s3, %s2474_s20  }
  0x38   :  { %s2475_s23 = smov [#allocation15]   ;;  %s2476_s25 = smov [#allocation3]  }
  0x39   :  { %s112_s24 = sshll.u32 %s2475_s23, 4  ;;  %s28_s26 = sshll.u32 %s2476_s25, 4  ;;  %s113_s24 = int_to_ptr.vmem [resolvable:$true] %s112_s24  ;;  %s29_s26 = int_to_ptr.vmem [resolvable:$true] %s28_s26 }
  0x3a   :  { %s2300_s13 = scalar_lea.hbm %s2837_s7, 1024 }
  0x3b   :  { %p2301_p10 = scmp.ne.s32.totalorder %s2837_s7, %s2300_s13  ;;  %p2304_p11 = scmp.lt.u32.totalorder %s2300_s13, %s2837_s7 }
  0x3d   :  { %p2306_p12 = pnand %p2304_p11, %p2301_p10 }
  0x3f   :  { %2309 = shalt.err (!%p2306_p12)
}
  0x40   :  { %s2310_s5 = scalar_lea.vmem %s113_s24, 1024  ;;  %p2315_p0 = scmp.lt.s32.totalorder %s113_s24, %s113_s24 }
  0x41   :  { %p2311_p13 = scmp.ne.s32.totalorder %s113_s24, %s2310_s5  ;;  %p2316_p1 = scmp.lt.s32.totalorder %s2310_s5, %s2310_s5 }
  0x43   :  { %p2317_p2 = por %p2316_p1, %p2315_p0 }
  0x45   :  { %p2318_p3 = pnand %p2317_p2, %p2311_p13 }
  0x47   :  { %2321 = shalt.err (!%p2318_p3)
}
  0x48   :  { %118 = dma.hbm_to_vmem [thread:$0]  %s2837_s7, 1024, %s113_s24, [#allocation16], %s2473_s3, %s2473_s3, %s2474_s20  }
  0x49   :  { %s2322_s23 = scalar_lea.hbm %s2830_s0, 256 }
  0x4a   :  { %p2323_p4 = scmp.ne.s32.totalorder %s2830_s0, %s2322_s23  ;;  %p2326_p5 = scmp.lt.u32.totalorder %s2322_s23, %s2830_s0 }
  0x4c   :  { %p2328_p6 = pnand %p2326_p5, %p2323_p4 }
  0x4e   :  { %2331 = shalt.err (!%p2328_p6)
}
  0x4f   :  { %s2332_s14 = scalar_lea.vmem %s29_s26, 256  ;;  %p2337_p8 = scmp.lt.s32.totalorder %s29_s26, %s29_s26 }
  0x50   :  { %p2333_p7 = scmp.ne.s32.totalorder %s29_s26, %s2332_s14  ;;  %p2338_p9 = scmp.lt.s32.totalorder %s2332_s14, %s2332_s14 }
  0x52   :  { %p2339_p10 = por %p2338_p9, %p2337_p8 }
  0x54   :  { %p2340_p11 = pnand %p2339_p10, %p2333_p7 }
  0x56   :  { %2343 = shalt.err (!%p2340_p11)
}
  0x57   :  { %34 = dma.hbm_to_vmem [thread:$0]  %s2830_s0, 256, %s29_s26, [#allocation4], %s2468_s29, %s2468_s29, %s2469_s30  }
  0x58   :  { %s2477_s15 = smov [#allocation8]   ;;  %s2344_s27 = scalar_lea.hbm %s2832_s2, 10240 }
  0x59   :  { %s52_s16 = sshll.u32 %s2477_s15, 4  ;;  %p2345_p12 = scmp.ne.s32.totalorder %s2832_s2, %s2344_s27  ;;  %s53_s16 = int_to_ptr.vmem [resolvable:$true] %s52_s16 }
  0x5a   :  { %p2348_p13 = scmp.lt.u32.totalorder %s2344_s27, %s2832_s2 }
  0x5c   :  { %p2350_p0 = pnand %p2348_p13, %p2345_p12 }
  0x5e   :  { %2353 = shalt.err (!%p2350_p0)
}
  0x5f   :  { %s2354_s25 = scalar_lea.vmem %s53_s16, 10240  ;;  %p2359_p2 = scmp.lt.s32.totalorder %s53_s16, %s53_s16 }
  0x60   :  { %p2355_p1 = scmp.ne.s32.totalorder %s53_s16, %s2354_s25  ;;  %p2360_p3 = scmp.lt.s32.totalorder %s2354_s25, %s2354_s25 }
  0x62   :  { %p2361_p4 = por %p2360_p3, %p2359_p2 }
  0x64   :  { %p2362_p5 = pnand %p2361_p4, %p2355_p1 }
  0x66   :  { %2365 = shalt.err (!%p2362_p5)
}
  0x67   :  { %s2478_s0 = smov 640   ;;  %s2479_s26 = smov 40  }
  0x68   :  { %58 = dma.hbm_to_vmem [thread:$0]  %s2832_s2, 10240, %s53_s16, [#allocation7], %s2478_s0, %s2478_s0, %s2479_s26  }
  0x69   :  { %s2480_s13 = smov [#allocation11]   ;;  %s2481_s7 = smov [#allocation14]  }
  0x6a   :  { %s76_s14 = sshll.u32 %s2480_s13, 4  ;;  %s100_s24 = sshll.u32 %s2481_s7, 4  ;;  %s77_s14 = int_to_ptr.vmem [resolvable:$true] %s76_s14  ;;  %s2642_s24 = int_to_ptr.vmem [resolvable:$true] %s100_s24 }
  0x6b   :  { %s2366_s5 = scalar_lea.hbm %s2834_s4, 512 }
  0x6c   :  { %p2367_p6 = scmp.ne.s32.totalorder %s2834_s4, %s2366_s5  ;;  %p2370_p7 = scmp.lt.u32.totalorder %s2366_s5, %s2834_s4 }
  0x6e   :  { %p2372_p8 = pnand %p2370_p7, %p2367_p6 }
  0x70   :  { %2375 = shalt.err (!%p2372_p8)
}
  0x71   :  { %s2376_s2 = scalar_lea.vmem %s77_s14, 512  ;;  %p2381_p10 = scmp.lt.s32.totalorder %s77_s14, %s77_s14 }
  0x72   :  { %p2377_p9 = scmp.ne.s32.totalorder %s77_s14, %s2376_s2  ;;  %p2382_p11 = scmp.lt.s32.totalorder %s2376_s2, %s2376_s2 }
  0x74   :  { %p2383_p12 = por %p2382_p11, %p2381_p10 }
  0x76   :  { %p2384_p13 = pnand %p2383_p12, %p2377_p9 }
  0x78   :  { %2387 = shalt.err (!%p2384_p13)
}
  0x79   :  { %82 = dma.hbm_to_vmem [thread:$0]  %s2834_s4, 512, %s77_s14, [#allocation10], %s2470_s1, %s2470_s1, %s2471_s18  }
  0x7a   :  { %s2388_s26 = scalar_lea.hbm %s2836_s6, 1024 }
  0x7b   :  { %p2389_p0 = scmp.ne.s32.totalorder %s2836_s6, %s2388_s26  ;;  %p2392_p1 = scmp.lt.u32.totalorder %s2388_s26, %s2836_s6 }
  0x7d   :  { %p2394_p2 = pnand %p2392_p1, %p2389_p0 }
  0x7f   :  { %2397 = shalt.err (!%p2394_p2)
}
  0x80   :  { %s2398_s15 = scalar_lea.vmem %s2642_s24, 1024  ;;  %p2403_p4 = scmp.lt.s32.totalorder %s2642_s24, %s2642_s24 }
  0x81   :  { %p2399_p3 = scmp.ne.s32.totalorder %s2642_s24, %s2398_s15  ;;  %p2404_p5 = scmp.lt.s32.totalorder %s2398_s15, %s2398_s15 }
  0x83   :  { %p2405_p6 = por %p2404_p5, %p2403_p4 }
  0x85   :  { %p2406_p7 = pnand %p2405_p6, %p2399_p3 }
  0x87   :  { %2409 = shalt.err (!%p2406_p7)
}
  0x88   :  { %106 = dma.hbm_to_vmem [thread:$0]  %s2836_s6, 1024, %s2642_s24, [#allocation13], %s2473_s3, %s2473_s3, %s2474_s20  }
  0x89   :  { %s2482_s18 = smov [#allocation17]   ;;  %s2410_s27 = scalar_lea.hbm %s2838_s8, 1024 }
  0x8a   :  { %s124_s14 = sshll.u32 %s2482_s18, 4  ;;  %p2411_p8 = scmp.ne.s32.totalorder %s2838_s8, %s2410_s27  ;;  %s125_s14 = int_to_ptr.vmem [resolvable:$true] %s124_s14 }
  0x8b   :  { %p2414_p9 = scmp.lt.u32.totalorder %s2410_s27, %s2838_s8 }
  0x8d   :  { %p2416_p10 = pnand %p2414_p9, %p2411_p8 }
  0x8f   :  { %2419 = shalt.err (!%p2416_p10)
}
  0x90   :  { %s2420_s16 = scalar_lea.vmem %s125_s14, 1024  ;;  %p2425_p12 = scmp.lt.s32.totalorder %s125_s14, %s125_s14 }
  0x91   :  { %p2421_p11 = scmp.ne.s32.totalorder %s125_s14, %s2420_s16  ;;  %p2426_p13 = scmp.lt.s32.totalorder %s2420_s16, %s2420_s16 }
  0x93   :  { %p2427_p0 = por %p2426_p13, %p2425_p12 }
  0x95   :  { %p2428_p1 = pnand %p2427_p0, %p2421_p11 }
  0x97   :  { %2431 = shalt.err (!%p2428_p1)
}
  0x98   :  { %130 = dma.hbm_to_vmem [thread:$0]  %s2838_s8, 1024, %s125_s14, [#allocation16], %s2473_s3, %s2473_s3, %s2474_s20  }
  0x99   :  { %2454 = dma.done.wait [#allocation4], 256  }
  0x9a   :  { %2455 = vsyncadd [#allocation4], 4294967040 }
  0x9b   :  { %2456 = dma.done.wait [#allocation7], 10496  }
  0x9c   :  { %2457 = vsyncadd [#allocation7], 4294956800 }
  0x9d   :  { %2458 = dma.done.wait [#allocation10], 1024  }
  0x9e   :  { %2459 = vsyncadd [#allocation10], 4294966272 }
  0x9f   :  { %2460 = dma.done.wait [#allocation13], 3072  }
  0xa0   :  { %2461 = vsyncadd [#allocation13], 4294964224 }
  0xa1   :  { %2462 = dma.done.wait [#allocation16], 2048  }
  0xa2   :  { %2463 = vsyncadd [#allocation16], 4294965248  ;;  %v2694_v0 = vld [vmem:[#allocation3] sm:$0xff]  ;;  %v2696_v1 = vld [vmem:[#allocation3 + $0x8] sm:$0xff]  ;;  %v2483_v51 = vmov 0   ;;  %vm1055_vm14 = vcmask 261120  }
  0xa3   :  { %v167_v2 = vmul.f32 %v2694_v0, %v2694_v0  ;;  %v183_v3 = vmul.f32 %v2696_v1, %v2696_v1  ;;  %v2042_v10 = vld [vmem:[#allocation8 + $0x4] ss:$40 sps:$4 sm:$0xff]   ;;  %v2046_v12 = vld [vmem:[#allocation8] ss:$40 sps:$4 sm:$0xff]   ;;  %v2048_v15 = vld [vmem:[#allocation8 + $0x54] ss:$40 sps:$4 sm:$0xff]   ;;  %714 = vmatprep.mubr.bf16.mxu0 %v2483_v51  ;;  %757 = vmatprep.mubr.bf16.mxu1 %v2483_v51 }
  0xa4   :  { %v2044_v11 = vld [vmem:[#allocation8 + $0xc] ss:$40 sps:$4 sm:$0xff]   ;;  %v2047_v14 = vld [vmem:[#allocation8 + $0x8] ss:$40 sps:$4 sm:$0xff]   ;;  %v2050_v16 = vld [vmem:[#allocation8 + $0x5c] ss:$40 sps:$4 sm:$0xff]   ;;  %682 = vmatprep.subr.bf16.mxu0 %v2042_v10 }
  0xa5   :  { %168 = vadd.xlane.f32.xlu0 %v167_v2  ;;  %725 = vmatprep.subr.bf16.mxu1 %v2044_v11  ;;  %v2052_v17 = vld [vmem:[#allocation8 + $0x50] ss:$40 sps:$4 sm:$0xff]   ;;  %v2054_v19 = vld [vmem:[#allocation8 + $0xa4] ss:$40 sps:$4 sm:$0xff]   ;;  %v2058_v21 = vld [vmem:[#allocation8 + $0xa0] ss:$40 sps:$4 sm:$0xff]  }
  0xa6   :  { %683 = vmatpush1.bf16.msra.mxu0 %v2046_v12  ;;  %726 = vmatpush1.bf16.msra.mxu1 %v2047_v14  ;;  %v2053_v18 = vld [vmem:[#allocation8 + $0x58] ss:$40 sps:$4 sm:$0xff]   ;;  %v2056_v20 = vld [vmem:[#allocation8 + $0xac] ss:$40 sps:$4 sm:$0xff]   ;;  %v2059_v22 = vld [vmem:[#allocation8 + $0xa8] ss:$40 sps:$4 sm:$0xff]  }
  0xa7   :  { %684 = vmatprep.subr.bf16.mxu0 %v2048_v15  ;;  %727 = vmatprep.subr.bf16.mxu1 %v2050_v16  ;;  %v2060_v23 = vld [vmem:[#allocation8 + $0xf4] ss:$40 sps:$4 sm:$0xff]   ;;  %v2064_v25 = vld [vmem:[#allocation8 + $0xf0] ss:$40 sps:$4 sm:$0xff]   ;;  %v2066_v27 = vld [vmem:[#allocation8 + $0x144] ss:$40 sps:$4 sm:$0xff]  }
  0xa8   :  { %v2062_v24 = vld [vmem:[#allocation8 + $0xfc] ss:$40 sps:$4 sm:$0xff]   ;;  %v2065_v26 = vld [vmem:[#allocation8 + $0xf8] ss:$40 sps:$4 sm:$0xff]   ;;  %v2068_v28 = vld [vmem:[#allocation8 + $0x14c] ss:$40 sps:$4 sm:$0xff]  }
  0xa9   :  { %184 = vadd.xlane.f32.xlu0 %v183_v3  ;;  %v2070_v29 = vld [vmem:[#allocation8 + $0x140] ss:$40 sps:$4 sm:$0xff]   ;;  %v2072_v31 = vld [vmem:[#allocation8 + $0x194] ss:$40 sps:$4 sm:$0xff]   ;;  %v2076_v33 = vld [vmem:[#allocation8 + $0x190] ss:$40 sps:$4 sm:$0xff]  }
  0xaa   :  { %685 = vmatpush1.bf16.msra.mxu0 %v2052_v17  ;;  %728 = vmatpush1.bf16.msra.mxu1 %v2053_v18  ;;  %v2071_v30 = vld [vmem:[#allocation8 + $0x148] ss:$40 sps:$4 sm:$0xff]   ;;  %v2074_v32 = vld [vmem:[#allocation8 + $0x19c] ss:$40 sps:$4 sm:$0xff]   ;;  %v2077_v34 = vld [vmem:[#allocation8 + $0x198] ss:$40 sps:$4 sm:$0xff]  }
  0xab   :  { %686 = vmatprep.subr.bf16.mxu0 %v2054_v19  ;;  %729 = vmatprep.subr.bf16.mxu1 %v2056_v20  ;;  %v2078_v38 = vld [vmem:[#allocation8 + $0x1e4] ss:$40 sps:$4 sm:$0xff]   ;;  %v2082_v40 = vld [vmem:[#allocation8 + $0x1e0] ss:$40 sps:$4 sm:$0xff]   ;;  %v2084_v43 = vld [vmem:[#allocation8 + $0x234] ss:$40 sps:$4 sm:$0xff]  }
  0xac   :  { %v2080_v39 = vld [vmem:[#allocation8 + $0x1ec] ss:$40 sps:$4 sm:$0xff]   ;;  %v2083_v41 = vld [vmem:[#allocation8 + $0x1e8] ss:$40 sps:$4 sm:$0xff]   ;;  %v2086_v44 = vld [vmem:[#allocation8 + $0x23c] ss:$40 sps:$4 sm:$0xff]  }
  0xad   :  { %v2088_v46 = vld [vmem:[#allocation8 + $0x230] ss:$40 sps:$4 sm:$0xff]   ;;  %v2092_v49 = vld [vmem:[#allocation8 + $0x14] ss:$40 sps:$4 sm:$0xff]   ;;  %v2110_v12 = vld [vmem:[#allocation8 + $0x104] ss:$40 sps:$4 sm:$0xff]  }
  0xae   :  { %687 = vmatpush1.bf16.msra.mxu0 %v2058_v21  ;;  %730 = vmatpush1.bf16.msra.mxu1 %v2059_v22  ;;  %v2089_v47 = vld [vmem:[#allocation8 + $0x238] ss:$40 sps:$4 sm:$0xff]   ;;  %v2095_v50 = vld [vmem:[#allocation8 + $0x1c] ss:$40 sps:$4 sm:$0xff]   ;;  %v2705_v59 = vld [vmem:[#allocation6] sm:$0xff] }
  0xaf   :  { %688 = vmatprep.subr.bf16.mxu0 %v2060_v23  ;;  %731 = vmatprep.subr.bf16.mxu1 %v2062_v24  ;;  %v2707_v60 = vld [vmem:[#allocation6 + $0x8] sm:$0xff]  ;;  %v2108_v14 = vld [vmem:[#allocation8 + $0x100] ss:$40 sps:$4 sm:$0xff]   ;;  %v2122_v20 = vld [vmem:[#allocation8 + $0x1a4] ss:$40 sps:$4 sm:$0xff]  }
  0xb0   :  { %v2090_v3 = vld [vmem:[#allocation8 + $0x10] ss:$40 sps:$4 sm:$0xff]   ;;  %v2116_v16 = vld [vmem:[#allocation8 + $0x154] ss:$40 sps:$4 sm:$0xff]   ;;  %v2120_v22 = vld [vmem:[#allocation8 + $0x1a0] ss:$40 sps:$4 sm:$0xff]  }
  0xb1   :  { %v2102_v10 = vld [vmem:[#allocation8 + $0xb0] ss:$40 sps:$4 sm:$0xff]   ;;  %v2119_v17 = vld [vmem:[#allocation8 + $0x15c] ss:$40 sps:$4 sm:$0xff]   ;;  %v2125_v21 = vld [vmem:[#allocation8 + $0x1ac] ss:$40 sps:$4 sm:$0xff]  }
  0xb2   :  { %689 = vmatpush1.bf16.msra.mxu0 %v2064_v25  ;;  %732 = vmatpush1.bf16.msra.mxu1 %v2065_v26  ;;  %v2105_v11 = vld [vmem:[#allocation8 + $0xb8] ss:$40 sps:$4 sm:$0xff]   ;;  %v2111_v15 = vld [vmem:[#allocation8 + $0x108] ss:$40 sps:$4 sm:$0xff]   ;;  %v2128_v24 = vld [vmem:[#allocation8 + $0x1f4] ss:$40 sps:$4 sm:$0xff]  }
  0xb3   :  { %690 = vmatprep.subr.bf16.mxu0 %v2066_v27  ;;  %733 = vmatprep.subr.bf16.mxu1 %v2068_v28  ;;  %v2114_v18 = vld [vmem:[#allocation8 + $0x150] ss:$40 sps:$4 sm:$0xff]   ;;  %v2131_v25 = vld [vmem:[#allocation8 + $0x1fc] ss:$40 sps:$4 sm:$0xff]  }
  0xb4   :  { %v2117_v19 = vld [vmem:[#allocation8 + $0x158] ss:$40 sps:$4 sm:$0xff]   ;;  %v2123_v23 = vld [vmem:[#allocation8 + $0x1a8] ss:$40 sps:$4 sm:$0xff]   ;;  %v2134_v28 = vld [vmem:[#allocation8 + $0x244] ss:$40 sps:$4 sm:$0xff]  }
  0xb5   :  { %v2126_v26 = vld [vmem:[#allocation8 + $0x1f0] ss:$40 sps:$4 sm:$0xff]  }
  0xb6   :  { %691 = vmatpush1.bf16.msra.mxu0 %v2070_v29  ;;  %734 = vmatpush1.bf16.msra.mxu1 %v2071_v30  ;;  %v2129_v27 = vld [vmem:[#allocation8 + $0x1f8] ss:$40 sps:$4 sm:$0xff]   ;;  %v2137_v29 = vld [vmem:[#allocation8 + $0x24c] ss:$40 sps:$4 sm:$0xff]  }
  0xb7   :  { %692 = vmatprep.subr.bf16.mxu0 %v2072_v31  ;;  %735 = vmatprep.subr.bf16.mxu1 %v2074_v32  ;;  %v2132_v30 = vld [vmem:[#allocation8 + $0x240] ss:$40 sps:$4 sm:$0xff]   ;;  %v2140_v32 = vld [vmem:[#allocation8 + $0x24] ss:$40 sps:$4 sm:$0xff]  }
  0xb8   :  { %v2135_v31 = vld [vmem:[#allocation8 + $0x248] ss:$40 sps:$4 sm:$0xff]  }
  0xba   :  { %693 = vmatpush1.bf16.msra.mxu0 %v2076_v33  ;;  %736 = vmatpush1.bf16.msra.mxu1 %v2077_v34  ;;  %v2138_v33 = vld [vmem:[#allocation8 + $0x20] ss:$40 sps:$4 sm:$0xff]   ;;  %v2143_v34 = vld [vmem:[#allocation8 + $0x74] ss:$40 sps:$4 sm:$0xff]  }
  0xbb   :  { %694 = vmatprep.subr.bf16.mxu0 %v2078_v38  ;;  %737 = vmatprep.subr.bf16.mxu1 %v2080_v39  ;;  %v2149_v38 = vld [vmem:[#allocation8 + $0x114] ss:$40 sps:$4 sm:$0xff]   ;;  %v2147_v39 = vld [vmem:[#allocation8 + $0x110] ss:$40 sps:$4 sm:$0xff]  }
  0xbe   :  { %695 = vmatpush1.bf16.msra.mxu0 %v2082_v40  ;;  %738 = vmatpush1.bf16.msra.mxu1 %v2083_v41  ;;  %v2152_v40 = vld [vmem:[#allocation8 + $0x164] ss:$40 sps:$4 sm:$0xff]   ;;  %v2150_v41 = vld [vmem:[#allocation8 + $0x160] ss:$40 sps:$4 sm:$0xff]  }
  0xbf   :  { %696 = vmatprep.subr.bf16.mxu0 %v2084_v43  ;;  %739 = vmatprep.subr.bf16.mxu1 %v2086_v44  ;;  %v2153_v43 = vld [vmem:[#allocation8 + $0x1b0] ss:$40 sps:$4 sm:$0xff]   ;;  %v2158_v44 = vld [vmem:[#allocation8 + $0x204] ss:$40 sps:$4 sm:$0xff]  }
  0xc2   :  { %697 = vmatpush1.bf16.msra.mxu0 %v2088_v46  ;;  %740 = vmatpush1.bf16.msra.mxu1 %v2089_v47  ;;  %v2161_v46 = vld [vmem:[#allocation8 + $0x254] ss:$40 sps:$4 sm:$0xff]   ;;  %v2159_v47 = vld [vmem:[#allocation8 + $0x250] ss:$40 sps:$4 sm:$0xff]  }
  0xc3   :  { %768 = vmatprep.subr.bf16.mxu0 %v2092_v49  ;;  %811 = vmatprep.subr.bf16.mxu1 %v2095_v50  ;;  %v901_v49 = vld [vmem:[#allocation11] sm:$0xff]  ;;  %v898_v50 = vld [vmem:[#allocation9 + $0x8] sm:$0xff] }
 0x132   :  { %v169_v4 = vpop.xlane.xlu0 %168 }
 0x133   :  { %v170_v5 = vrot.slane %v169_v4, 4 }
 0x135   :  { %v171_v6 = vadd.f32 %v170_v5, %v169_v4  ;;  %v2093_v4 = vld [vmem:[#allocation8 + $0x18] ss:$40 sps:$4 sm:$0xff]  }
 0x136   :  { %v185_v35 = vpop.xlane.xlu0 %184 }
 0x137   :  { %v172_v7 = vrot.slane %v171_v6, 2  ;;  %v186_v36 = vrot.slane %v185_v35, 4 }
 0x139   :  { %v173_v8 = vadd.f32 %v172_v7, %v171_v6  ;;  %v187_v37 = vadd.f32 %v186_v36, %v185_v35  ;;  %v2101_v6 = vld [vmem:[#allocation8 + $0x6c] ss:$40 sps:$4 sm:$0xff]   ;;  %v2099_v7 = vld [vmem:[#allocation8 + $0x68] ss:$40 sps:$4 sm:$0xff]  }
 0x13a   :  { %v2141_v35 = vld [vmem:[#allocation8 + $0x70] ss:$40 sps:$4 sm:$0xff]   ;;  %v2146_v36 = vld [vmem:[#allocation8 + $0xc4] ss:$40 sps:$4 sm:$0xff]  }
 0x13b   :  { %v174_v9 = vrot.slane %v173_v8, 1  ;;  %v188_v42 = vrot.slane %v187_v37, 2 }
 0x13d   :  { %v175_v13 = vadd.f32 %v174_v9, %v173_v8  ;;  %v189_v48 = vadd.f32 %v188_v42, %v187_v37  ;;  %v2104_v8 = vld [vmem:[#allocation8 + $0xb4] ss:$40 sps:$4 sm:$0xff]   ;;  %v2144_v37 = vld [vmem:[#allocation8 + $0xc0] ss:$40 sps:$4 sm:$0xff]  }
 0x13e   :  { %v2107_v9 = vld [vmem:[#allocation8 + $0xbc] ss:$40 sps:$4 sm:$0xff]  }
 0x13f   :  { %2004 = vpush %v175_v13  ;;  %v190_v52 = vrot.slane %v189_v48, 1  ;;  %v2113_v13 = vld [vmem:[#allocation8 + $0x10c] ss:$40 sps:$4 sm:$0xff]  }
 0x140   :  { %v2155_v42 = vld [vmem:[#allocation8 + $0x1b4] ss:$40 sps:$4 sm:$0xff]  }
 0x141   :  { %v191_v54 = vadd.f32 %v190_v52, %v189_v48  ;;  %v897_v48 = vld [vmem:[#allocation9] sm:$0xff]  ;;  %v902_v52 = vld [vmem:[#allocation11 + $0x8] sm:$0xff] }
 0x170   :  { %s2005_s8 = spop %2004 }
 0x171   :  { %v177_v45 = vstv %s2005_s8 }
 0x172   :  { %2202 = vrsqrt.f32 %v177_v45  ;;  %v2156_v45 = vld [vmem:[#allocation8 + $0x200] ss:$40 sps:$4 sm:$0xff]  }
 0x17c   :  { %v2203_v53 = vpop.eup %2202 }
 0x17d   :  { %2006 = vpush %v2203_v53 }
 0x17e   :  { %2008 = vpush %v191_v54 }
 0x1ae   :  { %s2007_s3 = spop %2006 }
 0x1af   :  { %s2009_s20 = spop %2008  ;;  %s180_s23 = smul.f32 16.0, %s2007_s3 }
 0x1b0   :  { %v193_v55 = vstv %s2009_s20 }
 0x1b1   :  { %2204 = vrsqrt.f32 %v193_v55  ;;  %v181_v57 = vstv %s180_s23  ;;  %v899_v55 = vld [vmem:[#allocation9 + $0x10] sm:$0xff] }
 0x1b2   :  { %v182_v58 = vmul.f32 %v181_v57, %v2694_v0  ;;  %v2098_v0 = vld [vmem:[#allocation8 + $0x64] ss:$40 sps:$4 sm:$0xff]  }
 0x1b4   :  { %v2711_v63 = vmul.f32 %v182_v58, %v2705_v59 }
 0x1bb   :  { %v2205_v56 = vpop.eup %2204 }
 0x1bc   :  { %2010 = vpush %v2205_v56  ;;  %v903_v56 = vld [vmem:[#allocation11 + $0x10] sm:$0xff] }
 0x1ed   :  { %s2011_s25 = spop %2010 }
 0x1ee   :  { %s196_s0 = smul.f32 16.0, %s2011_s25 }
 0x1f0   :  { %v197_v61 = vstv %s196_s0 }
 0x1f1   :  { %v198_v62 = vmul.f32 %v197_v61, %v2696_v1  ;;  %v2096_v1 = vld [vmem:[#allocation8 + $0x60] ss:$40 sps:$4 sm:$0xff]  }
 0x1f3   :  { %v2714_v2 = vmul.f32 %v198_v62, %v2707_v60 }
 0x1f5   :  { %v2718_v5 = vpack.c.bf16 %v2714_v2, %v2711_v63 }
 0x1f7   :  { %715 = vmatmul.mubr.bf16.vlgmr.msra.gmra.mrb[0].mxu0 %v2718_v5  ;;  %758 = vmatmul.mubr.bf16.vlgmr.msra.gmra.mrb[0].mxu1 %v2718_v5 }
 0x1f8   :  { %769 = vmatpush1.bf16.msra.mxu0 %v2090_v3  ;;  %812 = vmatpush1.bf16.msra.mxu1 %v2093_v4  ;;  %v900_v3 = vld [vmem:[#allocation9 + $0x18] sm:$0xff] }
 0x1f9   :  { %770 = vmatprep.subr.bf16.mxu0 %v2098_v0  ;;  %813 = vmatprep.subr.bf16.mxu1 %v2101_v6  ;;  %v904_v4 = vld [vmem:[#allocation11 + $0x18] sm:$0xff] }
 0x1fa   :  { %800 = vmatprep.mubr.bf16.mxu0 %v2483_v51  ;;  %843 = vmatprep.mubr.bf16.mxu1 %v2483_v51 }
 0x1fc   :  { %771 = vmatpush1.bf16.msra.mxu0 %v2096_v1  ;;  %814 = vmatpush1.bf16.msra.mxu1 %v2099_v7 }
 0x1fd   :  { %772 = vmatprep.subr.bf16.mxu0 %v2104_v8  ;;  %815 = vmatprep.subr.bf16.mxu1 %v2107_v9 }
 0x200   :  { %773 = vmatpush1.bf16.msra.mxu0 %v2102_v10  ;;  %816 = vmatpush1.bf16.msra.mxu1 %v2105_v11 }
 0x201   :  { %774 = vmatprep.subr.bf16.mxu0 %v2110_v12  ;;  %817 = vmatprep.subr.bf16.mxu1 %v2113_v13 }
 0x204   :  { %775 = vmatpush1.bf16.msra.mxu0 %v2108_v14  ;;  %818 = vmatpush1.bf16.msra.mxu1 %v2111_v15 }
 0x205   :  { %776 = vmatprep.subr.bf16.mxu0 %v2116_v16  ;;  %819 = vmatprep.subr.bf16.mxu1 %v2119_v17 }
 0x208   :  { %777 = vmatpush1.bf16.msra.mxu0 %v2114_v18  ;;  %820 = vmatpush1.bf16.msra.mxu1 %v2117_v19 }
 0x209   :  { %778 = vmatprep.subr.bf16.mxu0 %v2122_v20  ;;  %821 = vmatprep.subr.bf16.mxu1 %v2125_v21 }
 0x20c   :  { %779 = vmatpush1.bf16.msra.mxu0 %v2120_v22  ;;  %822 = vmatpush1.bf16.msra.mxu1 %v2123_v23 }
 0x20d   :  { %780 = vmatprep.subr.bf16.mxu0 %v2128_v24  ;;  %823 = vmatprep.subr.bf16.mxu1 %v2131_v25 }
 0x210   :  { %781 = vmatpush1.bf16.msra.mxu0 %v2126_v26  ;;  %824 = vmatpush1.bf16.msra.mxu1 %v2129_v27 }
 0x211   :  { %782 = vmatprep.subr.bf16.mxu0 %v2134_v28  ;;  %825 = vmatprep.subr.bf16.mxu1 %v2137_v29 }
 0x214   :  { %783 = vmatpush1.bf16.msra.mxu0 %v2132_v30  ;;  %826 = vmatpush1.bf16.msra.mxu1 %v2135_v31 }
 0x215   :  { %854 = vmatprep.subr.bf16.mxu0 %v2140_v32 }
 0x217   :  { %801 = vmatmul.mubr.bf16.vlgmr.msra.gmra.mrb[4].mxu0 %v2718_v5  ;;  %844 = vmatmul.mubr.bf16.vlgmr.msra.gmra.mrb[4].mxu1 %v2718_v5 }
 0x218   :  { %855 = vmatpush1.bf16.msra.mxu0 %v2138_v33  ;;  %886 = vmatprep.mubr.bf16.mxu0 %v2483_v51 }
 0x219   :  { %856 = vmatprep.subr.bf16.mxu0 %v2143_v34 }
 0x21c   :  { %857 = vmatpush1.bf16.msra.mxu0 %v2141_v35 }
 0x21d   :  { %858 = vmatprep.subr.bf16.mxu0 %v2146_v36 }
 0x220   :  { %859 = vmatpush1.bf16.msra.mxu0 %v2144_v37 }
 0x221   :  { %860 = vmatprep.subr.bf16.mxu0 %v2149_v38 }
 0x224   :  { %861 = vmatpush1.bf16.msra.mxu0 %v2147_v39 }
 0x225   :  { %862 = vmatprep.subr.bf16.mxu0 %v2152_v40 }
 0x228   :  { %863 = vmatpush1.bf16.msra.mxu0 %v2150_v41 }
 0x229   :  { %864 = vmatprep.subr.bf16.mxu0 %v2155_v42 }
 0x22c   :  { %865 = vmatpush1.bf16.msra.mxu0 %v2153_v43 }
 0x22d   :  { %866 = vmatprep.subr.bf16.mxu0 %v2158_v44 }
 0x230   :  { %867 = vmatpush1.bf16.msra.mxu0 %v2156_v45 }
 0x231   :  { %868 = vmatprep.subr.bf16.mxu0 %v2161_v46 }
 0x234   :  { %869 = vmatpush1.bf16.msra.mxu0 %v2159_v47  ;;  %v984_v47 = vlaneseq }
 0x237   :  { %887 = vmatmul.mubr.bf16.vlgmr.msra.gmra.mrb[8].mxu0 %v2718_v5 }
 0x2ca   :  { %v716_v53 = vpop.f32.mrb[0].mxu0  ;;  %v759_v54 = vpop.f32.mrb[0].mxu1 }
 0x2cb   :  { %v905_v57 = vmul.f32 %v897_v48, %v716_v53  ;;  %v909_v58 = vmul.f32 %v901_v49, %v759_v54  ;;  %v718_v61 = vpop.f32.mrb[1].mxu0  ;;  %v761_v62 = vpop.f32.mrb[1].mxu1 }
 0x2cc   :  { %v906_v0 = vmul.f32 %v898_v50, %v718_v61  ;;  %v910_v6 = vmul.f32 %v902_v52, %v761_v62  ;;  %v720_v1 = vpop.f32.mrb[2].mxu0  ;;  %v763_v7 = vpop.f32.mrb[2].mxu1  ;;  %v2484_v62 = vmov -1e+30  }
 0x2cd   :  { %v913_v8 = vadd.f32 %v909_v58, %v905_v57  ;;  %v907_v5 = vmul.f32 %v899_v55, %v720_v1  ;;  %v911_v9 = vmul.f32 %v903_v56, %v763_v7  ;;  %v722_v10 = vpop.f32.mrb[3].mxu0  ;;  %v765_v11 = vpop.f32.mrb[3].mxu1 }
 0x2ce   :  { %v914_v12 = vadd.f32 %v910_v6, %v906_v0  ;;  %v908_v13 = vmul.f32 %v900_v3, %v722_v10  ;;  %v912_v14 = vmul.f32 %v904_v4, %v765_v11 }
 0x2cf   :  { %v915_v15 = vadd.f32 %v911_v9, %v907_v5 }
 0x2d0   :  { %v916_v16 = vadd.f32 %v912_v14, %v908_v13 }
 0x2d1   :  { %v929_v17 = vpack.c.bf16 %v915_v15, %v913_v8 }
 0x2d2   :  { %v930_v18 = vpack.c.bf16 %v916_v16, %v914_v12 }
 0x2d3   :  { %1932 = vmatprep.mubr.bf16.mxu1 %v929_v17 }
 0x2ea   :  { %v802_v19 = vpop.f32.mrb[4].mxu0  ;;  %v845_v20 = vpop.f32.mrb[4].mxu1 }
 0x2eb   :  { %v917_v21 = vmul.f32 %v897_v48, %v802_v19  ;;  %v921_v22 = vmul.f32 %v901_v49, %v845_v20  ;;  %v804_v23 = vpop.f32.mrb[5].mxu0  ;;  %v847_v24 = vpop.f32.mrb[5].mxu1  ;;  %v990_v48 = vand.u32 127, %v984_v47 }
 0x2ec   :  { %v918_v25 = vmul.f32 %v898_v50, %v804_v23  ;;  %v922_v26 = vmul.f32 %v902_v52, %v847_v24  ;;  %v806_v27 = vpop.f32.mrb[6].mxu0  ;;  %v849_v28 = vpop.f32.mrb[6].mxu1  ;;  %v2730_v52 = vshrl.u32 %v984_v47, 7 }
 0x2ed   :  { %v925_v29 = vadd.f32 %v921_v22, %v917_v21  ;;  %v919_v30 = vmul.f32 %v899_v55, %v806_v27  ;;  %v923_v31 = vmul.f32 %v903_v56, %v849_v28  ;;  %v808_v32 = vpop.f32.mrb[7].mxu0  ;;  %v851_v33 = vpop.f32.mrb[7].mxu1  ;;  %vm999_vm0 = vcmp.ge.s32.totalorder %v990_v48, 8 }
 0x2ee   :  { %v926_v34 = vadd.f32 %v922_v26, %v918_v25  ;;  %v920_v35 = vmul.f32 %v900_v3, %v808_v32  ;;  %v924_v36 = vmul.f32 %v904_v4, %v851_v33  ;;  %vm1013_vm1 = vcmp.ge.s32.totalorder %v990_v48, 16 }
 0x2ef   :  { %v927_v37 = vadd.f32 %v923_v31, %v919_v30  ;;  %v1000_v49 = vsel %vm999_vm0, 1, %v2483_v51  ;;  %v1014_v50 = vsel %vm1013_vm1, 1, %v2483_v51  ;;  %vm1028_vm2 = vcmp.ge.s32.totalorder %v990_v48, 24 }
 0x2f0   :  { %v928_v38 = vadd.f32 %v924_v36, %v920_v35  ;;  %v1015_v53 = vadd.s32 %v1014_v50, %v1000_v49  ;;  %v1029_v54 = vsel %vm1028_vm2, 1, %v2483_v51  ;;  %v987_v55 = vadd.s32 16, %v2730_v52 }
 0x2f1   :  { %v931_v39 = vpack.c.bf16 %v927_v37, %v925_v29  ;;  %v986_v57 = vadd.s32 8, %v2730_v52  ;;  %vm1035_vm6 = vcmp.le.s32.totalorder %v990_v48, %v2730_v52  ;;  %v988_v58 = vadd.s32 24, %v2730_v52 }
 0x2f2   :  { %v932_v40 = vpack.c.bf16 %v928_v38, %v926_v34  ;;  %v1030_v56 = vadd.s32 %v1029_v54, %v1015_v53  ;;  %vm1037_vm4 = vcmp.le.s32.totalorder %v990_v48, %v987_v55  ;;  %v2163_v55 = vld [vmem:[#allocation12] sm:$0xff]   ;;  %vm2486_vm0 = vmmov 0  }
 0x2f3   :  { %1928 = vmatprep.subr.bf16.mxu1 %v931_v39  ;;  %vm1036_vm9 = vcmp.le.s32.totalorder %v990_v48, %v986_v57  ;;  %vm1038_vm13 = vcmp.le.s32.totalorder %v990_v48, %v988_v58  ;;  %v2164_v57 = vld [vmem:[#allocation12 + $0x48] sm:$0xff]  }
 0x2f4   :  { %1929 = vmatpush3.bf16.xpose.msra.mxu1 %v931_v39  ;;  %vm1825_vm3 = vcmp.eq.s32.totalorder %v1030_v56, 2  ;;  %vm1823_vm5 = vcmp.eq.s32.totalorder %v1030_v56, 0  ;;  %vm1824_vm8 = vcmp.eq.s32.totalorder %v1030_v56, 1  ;;  %vm1826_vm12 = vcmp.eq.s32.totalorder %v1030_v56, 3  ;;  %v2162_v39 = vld [vmem:[#allocation12 + $0x40] sm:$0xff]   ;;  %v2165_v58 = vld [vmem:[#allocation12 + $0x8] sm:$0xff]  }
 0x2f5   :  { %1930 = vmatprep.subr.bf16.mxu1 %v932_v40  ;;  %vm1041_vm7 = vmand %vm1825_vm3, %vm1037_vm4 }
 0x2f6   :  { %vm1039_vm10 = vmand %vm1823_vm5, %vm1035_vm6  ;;  %v1049_v3 = vsel %vm1041_vm7, 0.0, %v2484_v62 }
 0x2f7   :  { %vm1040_vm11 = vmand %vm1824_vm8, %vm1036_vm9  ;;  %v1047_v0 = vsel %vm1039_vm10, 0.0, %v2484_v62 }
 0x2f8   :  { %v1048_v5 = vsel %vm1040_vm11, 0.0, %v2484_v62  ;;  %vm1042_vm15 = vmand %vm1826_vm12, %vm1038_vm13 }
 0x2f9   :  { %v1050_v15 = vsel %vm1042_vm15, 0.0, %v2484_v62  ;;  %v2167_v62 = vld [vmem:[#allocation12 + $0x10] sm:$0xff]  }
 0x2fc   :  { %1931 = vmatpush3.bf16.xpose.msra.mxu1 %v932_v40 }
 0x303   :  { %1933 = vmatmul.mubr.bf16.vlgmr.msra.gmra.mrb[8].mxu1 %v930_v18 }
 0x30a   :  { %v888_v41 = vpop.f32.mrb[8].mxu0 }
 0x30b   :  { %v890_v42 = vpop.f32.mrb[9].mxu0 }
 0x30c   :  { %v892_v43 = vpop.f32.mrb[10].mxu0 }
 0x30d   :  { %v933_v44 = vpack.c.bf16 %v892_v43, %v888_v41  ;;  %v894_v45 = vpop.f32.mrb[11].mxu0 }
 0x30e   :  { %v934_v46 = vpack.c.bf16 %v894_v45, %v890_v42 }
 0x30f   :  { %1936 = vmatprep.subr.bf16.mxu1 %v933_v44 }
 0x310   :  { %1937 = vmatpush3.bf16.msra.mxu1 %v933_v44 }
 0x311   :  { %1938 = vmatprep.subr.bf16.mxu1 %v934_v46 }
 0x314   :  { %1939 = vmatpush3.bf16.msra.mxu1 %v934_v46 }
 0x315   :  { %1879 = vmatprep.subr.bf16.mxu1 %v2162_v39  ;;  %v2180_v39 = vld [vmem:[#allocation14 + $0x10] sm:$0xff]  }
 0x3d6   :  { %v1934_v61 = vpop.f32.mrb[8].mxu1 }
 0x3d7   :  { %v1045_v51 = vmul.f32 0.17677669, %v1934_v61  ;;  %v969_v4 = vpop.f32.mrb[9].mxu1  ;;  %v2166_v61 = vld [vmem:[#allocation12 + $0x50] sm:$0xff]  }
 0x3d8   :  { %v1043_v6 = vmul.f32 0.17677669, %v969_v4  ;;  %v1935_v1 = vpop.f32.mrb[10].mxu1  ;;  %v2170_v4 = vld [vmem:[#allocation12 + $0x60] sm:$0xff]  }
 0x3d9   :  { %v972_v7 = vpop.f32.mrb[11].mxu1  ;;  %v1053_v8 = vadd.f32 %v1049_v3, %v1045_v51  ;;  %v1046_v12 = vmul.f32 0.17677669, %v1935_v1  ;;  %v2168_v3 = vld [vmem:[#allocation12 + $0x58] sm:$0xff]   ;;  %v2173_v1 = vld [vmem:[#allocation12 + $0x28] sm:$0xff]  }
 0x3da   :  { %v1044_v9 = vmul.f32 0.17677669, %v972_v7  ;;  %v1051_v10 = vadd.f32 %v1047_v0, %v1043_v6  ;;  %v2169_v51 = vld [vmem:[#allocation12 + $0x18] sm:$0xff]   ;;  %v2171_v0 = vld [vmem:[#allocation12 + $0x20] sm:$0xff]   ;;  %v2172_v6 = vld [vmem:[#allocation12 + $0x68] sm:$0xff]  }
 0x3db   :  { %v1062_v11 = vsel %vm1055_vm14, %v1053_v8, -inf  ;;  %v1054_v17 = vadd.f32 %v1050_v15, %v1046_v12  ;;  %v2174_v7 = vld [vmem:[#allocation12 + $0x70] sm:$0xff]  }
 0x3dc   :  { %1063 = vmax.xlane.f32.xlu0 %v1062_v11  ;;  %v1056_v13 = vsel %vm1055_vm14, %v1051_v10, -inf  ;;  %v1052_v14 = vadd.f32 %v1048_v5, %v1044_v9  ;;  %v2176_v5 = vld [vmem:[#allocation12 + $0x78] sm:$0xff]  }
 0x3dd   :  { %1057 = vmax.xlane.f32.xlu1 %v1056_v13  ;;  %v1065_v18 = vsel %vm1055_vm14, %v1054_v17, -inf  ;;  %v2177_v9 = vld [vmem:[#allocation12 + $0x38] sm:$0xff]  }
 0x3de   :  { %v1059_v16 = vsel %vm1055_vm14, %v1052_v14, -inf }
 0x3e1   :  { %1060 = vmax.xlane.f32.xlu1 %v1059_v16  ;;  %v1194_v16 = vsub.s32 0, %v2730_v52 }
 0x3e5   :  { %1066 = vmax.xlane.f32.xlu1 %v1065_v18 }
 0x469   :  { %v1064_v19 = vpop.xlane.xlu0 %1063 }
 0x46a   :  { %v1070_v20 = vsub.f32 %v1053_v8, %v1064_v19  ;;  %v1058_v21 = vpop.xlane.xlu1 %1057  ;;  %v2175_v8 = vld [vmem:[#allocation12 + $0x30] sm:$0xff]  }
 0x46b   :  { %v1068_v22 = vsub.f32 %v1051_v10, %v1058_v21 }
 0x46c   :  { %v1076_v23 = vmul.f32 1.442695, %v1070_v20 }
 0x46d   :  { %v1072_v24 = vmul.f32 1.442695, %v1068_v22 }
 0x46e   :  { %v1061_v25 = vpop.xlane.xlu1 %1060 }
 0x46f   :  { %2206 = vpow2.f32 %v1072_v24  ;;  %v1069_v26 = vsub.f32 %v1052_v14, %v1061_v25 }
 0x470   :  { %2208 = vpow2.f32 %v1076_v23 }
 0x471   :  { %v1074_v27 = vmul.f32 1.442695, %v1069_v26 }
 0x472   :  { %v1067_v28 = vpop.xlane.xlu1 %1066 }
 0x473   :  { %2210 = vpow2.f32 %v1074_v27  ;;  %v1071_v29 = vsub.f32 %v1054_v17, %v1067_v28  ;;  %v2751_v17 = vld [vmem:[%s2839_s9] sm:$0xf] }
 0x474   :  { %v1195_v19 = vrot.slane %v2751_v17, %v1194_v16  ;;  %v2200_v16 = vld [vmem:[#allocation15 + $0x38] sm:$0xff]  }
 0x475   :  { %v1078_v30 = vmul.f32 1.442695, %v1071_v29 }
 0x477   :  { %2212 = vpow2.f32 %v1078_v30 }
 0x479   :  { %v2207_v31 = vpop.eup %2206 }
 0x47a   :  { %v1080_v32 = vsel %vm1055_vm14, %v2207_v31, 0.0  ;;  %v2209_v33 = vpop.eup %2208 }
 0x47b   :  { %1081 = vadd.xlane.f32.xlu0 %v1080_v32  ;;  %v1086_v35 = vsel %vm1055_vm14, %v2209_v33, 0.0 }
 0x47d   :  { %v2211_v34 = vpop.eup %2210 }
 0x47e   :  { %v1083_v36 = vsel %vm1055_vm14, %v2211_v34, 0.0 }
 0x47f   :  { %1087 = vadd.xlane.f32.xlu0 %v1086_v35  ;;  %1084 = vadd.xlane.f32.xlu1 %v1083_v36 }
 0x481   :  { %v2213_v37 = vpop.eup %2212 }
 0x482   :  { %v1089_v38 = vsel %vm1055_vm14, %v2213_v37, 0.0 }
 0x483   :  { %1090 = vadd.xlane.f32.xlu1 %v1089_v38  ;;  %v2485_v38 = vmov 0.0  }
 0x484   :  { %1944 = vmatprep.subr.bf16.mxu0 %v2485_v38  ;;  %1960 = vmatprep.mubr.msk.bf16.mxu0 %vm2486_vm0, %v2485_v38 }
 0x508   :  { %v1082_v40 = vpop.xlane.xlu0 %1081 }
 0x509   :  { %2214 = vrcp.f32 %v1082_v40  ;;  %v2181_v40 = vld [vmem:[#allocation14 + $0x18] sm:$0xff]  }
 0x50c   :  { %v1088_v41 = vpop.xlane.xlu0 %1087  ;;  %v1085_v42 = vpop.xlane.xlu1 %1084 }
 0x50d   :  { %2216 = vrcp.f32 %v1085_v42  ;;  %v2183_v42 = vld [vmem:[#allocation14 + $0x28] sm:$0xff]  }
 0x50e   :  { %2218 = vrcp.f32 %v1088_v41  ;;  %v2182_v41 = vld [vmem:[#allocation14 + $0x20] sm:$0xff]  }
 0x510   :  { %v1091_v43 = vpop.xlane.xlu1 %1090 }
 0x511   :  { %2220 = vrcp.f32 %v1091_v43 }
 0x513   :  { %v2215_v44 = vpop.eup %2214 }
 0x514   :  { %v1096_v47 = vmul.f32 %v2215_v44, %v2207_v31 }
 0x517   :  { %v2217_v45 = vpop.eup %2216 }
 0x518   :  { %v2219_v46 = vpop.eup %2218  ;;  %v1097_v48 = vmul.f32 %v2217_v45, %v2211_v34 }
 0x519   :  { %v1098_v53 = vmul.f32 %v2219_v46, %v2209_v33  ;;  %v2184_v46 = vld [vmem:[#allocation14 + $0x30] sm:$0xff]  }
 0x51a   :  { %v1100_v50 = vpack.c.bf16 %v1097_v48, %v1096_v47 }
 0x51b   :  { %v2221_v49 = vpop.eup %2220 }
 0x51c   :  { %v1099_v54 = vmul.f32 %v2221_v49, %v2213_v37  ;;  %1940 = vmatprep.mubr.msk.bf16.mxu1 %vm1055_vm14, %v1100_v50  ;;  %v2178_v37 = vld [vmem:[#allocation14] sm:$0xff]   ;;  %v2185_v49 = vld [vmem:[#allocation14 + $0x38] sm:$0xff]  }
 0x51d   :  { %1945 = vmatpush3.bf16.msra.mxu0 %v2178_v37 }
 0x51e   :  { %v1101_v56 = vpack.c.bf16 %v1099_v54, %v1098_v53  ;;  %1946 = vmatprep.subr.bf16.mxu0 %v2485_v38  ;;  %v2186_v53 = vld [vmem:[#allocation15] sm:$0xff]  }
 0x520   :  { %1941 = vmatmul.mubr.msk.bf16.vlgmr.msra.gmra.mrb[12].mxu1 %vm1055_vm14, %v1101_v56 }
 0x521   :  { %1880 = vmatpush3.bf16.msra.mxu1 %v2163_v55  ;;  %v2188_v55 = vld [vmem:[#allocation15 + $0x8] sm:$0xff]  }
 0x522   :  { %1881 = vmatprep.subr.bf16.mxu1 %v2164_v57 }
 0x525   :  { %1882 = vmatpush3.bf16.msra.mxu1 %v2165_v58  ;;  %v2190_v58 = vld [vmem:[#allocation15 + $0x10] sm:$0xff]  }
 0x526   :  { %1883 = vmatprep.subr.bf16.mxu1 %v2166_v61  ;;  %v2192_v61 = vld [vmem:[#allocation15 + $0x18] sm:$0xff]  }
 0x529   :  { %1884 = vmatpush3.bf16.msra.mxu1 %v2167_v62  ;;  %v2194_v62 = vld [vmem:[#allocation15 + $0x20] sm:$0xff]  }
 0x52a   :  { %1885 = vmatprep.subr.bf16.mxu1 %v2168_v3  ;;  %v2196_v3 = vld [vmem:[#allocation15 + $0x28] sm:$0xff]  }
 0x52d   :  { %1886 = vmatpush3.bf16.msra.mxu1 %v2169_v51 }
 0x52e   :  { %1887 = vmatprep.subr.bf16.mxu1 %v2170_v4 }
 0x531   :  { %1888 = vmatpush3.bf16.msra.mxu1 %v2171_v0 }
 0x532   :  { %1889 = vmatprep.subr.bf16.mxu1 %v2172_v6 }
 0x535   :  { %1890 = vmatpush3.bf16.msra.mxu1 %v2173_v1 }
 0x536   :  { %1891 = vmatprep.subr.bf16.mxu1 %v2174_v7 }
 0x539   :  { %1892 = vmatpush3.bf16.msra.mxu1 %v2175_v8 }
 0x53a   :  { %1893 = vmatprep.subr.bf16.mxu1 %v2176_v5 }
 0x53d   :  { %1894 = vmatpush3.bf16.msra.mxu1 %v2177_v9  ;;  %v2187_v9 = vld [vmem:[#allocation17] sm:$0xff]  }
 0x53e   :  { %1964 = vmatprep.subr.bf16.mxu1 %v2485_v38 }
 0x5f3   :  { %v1942_v10 = vpop.f32.mrb[12].mxu1 }
 0x5f4   :  { %v1142_v11 = vpop.f32.mrb[13].mxu1 }
 0x5f5   :  { %v1943_v12 = vpop.f32.mrb[14].mxu1 }
 0x5f6   :  { %v1159_v13 = vpack.c.bf16 %v1943_v12, %v1942_v10  ;;  %v1145_v14 = vpop.f32.mrb[15].mxu1  ;;  %v2191_v12 = vld [vmem:[#allocation17 + $0x10] sm:$0xff]  }
 0x5f7   :  { %v1158_v15 = vpack.c.bf16 %v1145_v14, %v1142_v11  ;;  %v2189_v11 = vld [vmem:[#allocation17 + $0x8] sm:$0xff]   ;;  %v2198_v14 = vld [vmem:[#allocation15 + $0x30] sm:$0xff]  }
 0x5f8   :  { %1324 = vmatprep.mubr.bf16.mxu1 %v1159_v13  ;;  %v2197_v13 = vld [vmem:[#allocation17 + $0x28] sm:$0xff]  }
 0x5f9   :  { %1325 = vmatmul.mubr.bf16.vlgmr.msra.gmra.mrb[16].mxu1 %v1158_v15  ;;  %v2199_v15 = vld [vmem:[#allocation17 + $0x30] sm:$0xff]  }
 0x5fa   :  { %1980 = vmatprep.mubr.msk.bf16.mxu1 %vm2486_vm0, %v2485_v38  ;;  %1965 = vmatpush3.bf16.msra.mxu1 %v2186_v53 }
 0x5fb   :  { %1966 = vmatprep.subr.bf16.mxu1 %v2485_v38 }
 0x5fe   :  { %1967 = vmatpush3.bf16.msra.mxu1 %v2188_v55 }
 0x5ff   :  { %1968 = vmatprep.subr.bf16.mxu1 %v2485_v38 }
 0x602   :  { %1969 = vmatpush3.bf16.msra.mxu1 %v2190_v58 }
 0x603   :  { %1970 = vmatprep.subr.bf16.mxu1 %v2485_v38 }
 0x606   :  { %1971 = vmatpush3.bf16.msra.mxu1 %v2192_v61 }
 0x607   :  { %1972 = vmatprep.subr.bf16.mxu1 %v2485_v38 }
 0x60a   :  { %1973 = vmatpush3.bf16.msra.mxu1 %v2194_v62 }
 0x60b   :  { %1974 = vmatprep.subr.bf16.mxu1 %v2485_v38 }
 0x60e   :  { %1975 = vmatpush3.bf16.msra.mxu1 %v2196_v3 }
 0x60f   :  { %1976 = vmatprep.subr.bf16.mxu1 %v2485_v38 }
 0x612   :  { %1977 = vmatpush3.bf16.msra.mxu1 %v2198_v14 }
 0x613   :  { %1978 = vmatprep.subr.bf16.mxu1 %v2485_v38 }
 0x616   :  { %1979 = vmatpush3.bf16.msra.mxu1 %v2200_v16 }
 0x6cc   :  { %v1895_v18 = vpop.f32.mrb[16].mxu1 }
 0x6cd   :  { %v1896_v20 = vpop.f32.mrb[17].mxu1 }
 0x6ce   :  { %v1897_v21 = vadd.f32 %v1896_v20, %v1895_v18  ;;  %v1898_v22 = vpop.f32.mrb[18].mxu1  ;;  %v2201_v18 = vld [vmem:[#allocation17 + $0x38] sm:$0xff]  }
 0x6cf   :  { %v1899_v23 = vpop.f32.mrb[19].mxu1 }
 0x6d0   :  { %v1327_v24 = vadd.f32 %v1897_v21, %v1195_v19  ;;  %v1900_v25 = vadd.f32 %v1899_v23, %v1898_v22 }
 0x6d2   :  { %v1330_v26 = vadd.f32 %v1900_v25, %v1195_v19  ;;  %v2755_v27 = vadd.f32 %v1327_v24, %v2711_v63  ;;  %v1388_v19 = vsub.s32 1, %v2730_v52 }
 0x6d4   :  { %v1335_v28 = vmul.f32 %v2755_v27, %v2755_v27  ;;  %v2760_v29 = vadd.f32 %v1330_v26, %v2714_v2  ;;  %v2179_v2 = vld [vmem:[#allocation14 + $0x8] sm:$0xff]   ;;  %v1389_v20 = vrot.slane %v2751_v17, %v1388_v19 }
 0x6d5   :  { %1947 = vmatpush3.bf16.msra.mxu0 %v2179_v2 }
 0x6d6   :  { %1336 = vadd.xlane.f32.xlu0 %v1335_v28  ;;  %v1351_v30 = vmul.f32 %v2760_v29, %v2760_v29  ;;  %1948 = vmatprep.subr.bf16.mxu0 %v2485_v38  ;;  %v1498_v28 = vsub.s32 2, %v2730_v52 }
 0x6d8   :  { %1352 = vadd.xlane.f32.xlu1 %v1351_v30 }
 0x6d9   :  { %1949 = vmatpush3.bf16.msra.mxu0 %v2180_v39 }
 0x6da   :  { %1950 = vmatprep.subr.bf16.mxu0 %v2485_v38 }
 0x6dd   :  { %1951 = vmatpush3.bf16.msra.mxu0 %v2181_v40 }
 0x6de   :  { %1952 = vmatprep.subr.bf16.mxu0 %v2485_v38 }
 0x6e1   :  { %1953 = vmatpush3.bf16.msra.mxu0 %v2182_v41 }
 0x6e2   :  { %1954 = vmatprep.subr.bf16.mxu0 %v2485_v38 }
 0x6e5   :  { %1955 = vmatpush3.bf16.msra.mxu0 %v2183_v42 }
 0x6e6   :  { %1956 = vmatprep.subr.bf16.mxu0 %v2485_v38 }
 0x6e9   :  { %1957 = vmatpush3.bf16.msra.mxu0 %v2184_v46 }
 0x6ea   :  { %1958 = vmatprep.subr.bf16.mxu0 %v2485_v38 }
 0x6ed   :  { %1959 = vmatpush3.bf16.msra.mxu0 %v2185_v49 }
 0x6ee   :  { %1984 = vmatprep.subr.bf16.mxu0 %v2485_v38 }
 0x763   :  { %v1337_v31 = vpop.xlane.xlu0 %1336 }
 0x764   :  { %v1338_v32 = vrot.slane %v1337_v31, 4 }
 0x765   :  { %v1353_v43 = vpop.xlane.xlu1 %1352 }
 0x766   :  { %v1339_v33 = vadd.f32 %v1338_v32, %v1337_v31  ;;  %v1354_v44 = vrot.slane %v1353_v43, 4  ;;  %v1699_v31 = vstv %s2840_s10  ;;  %s2487_s10 = smov [#allocation18]  }
 0x767   :  { %s1727_s14 = sshll.u32 %s2487_s10, 4  ;;  %s1728_s14 = int_to_ptr.vmem [resolvable:$true] %s1727_s14 }
 0x768   :  { %v1340_v34 = vrot.slane %v1339_v33, 2  ;;  %v1355_v45 = vadd.f32 %v1354_v44, %v1353_v43  ;;  %s2432_s17 = scalar_lea.vmem %s1728_s14, 256  ;;  %p2437_p3 = scmp.lt.s32.totalorder %s1728_s14, %s1728_s14 }
 0x769   :  { %p2433_p2 = scmp.ne.s32.totalorder %s1728_s14, %s2432_s17  ;;  %p2438_p4 = scmp.lt.s32.totalorder %s2432_s17, %s2432_s17 }
 0x76a   :  { %v1341_v35 = vadd.f32 %v1340_v34, %v1339_v33  ;;  %v1356_v47 = vrot.slane %v1355_v45, 2 }
 0x76b   :  { %p2439_p5 = por %p2438_p4, %p2437_p3 }
 0x76c   :  { %v1342_v36 = vrot.slane %v1341_v35, 1  ;;  %v1357_v50 = vadd.f32 %v1356_v47, %v1355_v45  ;;  %v1607_v47 = vsub.s32 3, %v2730_v52 }
 0x76d   :  { %p2440_p6 = pnand %p2439_p5, %p2433_p2 }
 0x76e   :  { %v1343_v63 = vadd.f32 %v1342_v36, %v1341_v35  ;;  %v1358_v54 = vrot.slane %v1357_v50, 1 }
 0x770   :  { %2012 = vpush %v1343_v63  ;;  %v1359_v57 = vadd.f32 %v1358_v54, %v1357_v50 }
 0x7a1   :  { %s2013_s9 = spop %2012 }
 0x7a2   :  { %v1345_v48 = vstv %s2013_s9 }
 0x7a3   :  { %2222 = vrsqrt.f32 %v1345_v48  ;;  %v1608_v48 = vrot.slane %v2751_v17, %v1607_v47 }
 0x7ad   :  { %v2223_v56 = vpop.eup %2222 }
 0x7ae   :  { %2014 = vpush %v2223_v56 }
 0x7af   :  { %2016 = vpush %v1359_v57 }
 0x7df   :  { %s2015_s12 = spop %2014 }
 0x7e0   :  { %s2017_s13 = spop %2016  ;;  %s1348_s7 = smul.f32 16.0, %s2015_s12 }
 0x7e1   :  { %v1361_v51 = vstv %s2017_s13 }
 0x7e2   :  { %2224 = vrsqrt.f32 %v1361_v51  ;;  %v1349_v0 = vstv %s1348_s7 }
 0x7e3   :  { %v1350_v6 = vmul.f32 %v1349_v0, %v2755_v27 }
 0x7e5   :  { %v2787_v8 = vmul.f32 %v1350_v6, %v2705_v59  ;;  %v2193_v59 = vld [vmem:[#allocation17 + $0x18] sm:$0xff]  }
 0x7ec   :  { %v2225_v4 = vpop.eup %2224 }
 0x7ed   :  { %2018 = vpush %v2225_v4 }
 0x81e   :  { %s2019_s15 = spop %2018 }
 0x81f   :  { %s1364_s4 = smul.f32 16.0, %s2019_s15 }
 0x821   :  { %v1365_v1 = vstv %s1364_s4 }
 0x822   :  { %v1366_v7 = vmul.f32 %v1365_v1, %v2760_v29  ;;  %v1499_v29 = vrot.slane %v2751_v17, %v1498_v28 }
 0x824   :  { %v2790_v5 = vmul.f32 %v1366_v7, %v2707_v60  ;;  %v2195_v60 = vld [vmem:[#allocation17 + $0x20] sm:$0xff]  }
 0x826   :  { %v1369_v10 = vpack.c.bf16 %v2790_v5, %v2787_v8 }
 0x828   :  { %1961 = vmatmul.mubr.bf16.vlgmr.msra.gmra.mrb[12].mxu0 %v1369_v10 }
 0x829   :  { %1985 = vmatpush3.bf16.msra.mxu0 %v2187_v9  ;;  %2000 = vmatprep.mubr.msk.bf16.mxu0 %vm2486_vm0, %v2485_v38 }
 0x82a   :  { %1986 = vmatprep.subr.bf16.mxu0 %v2485_v38 }
 0x82d   :  { %1987 = vmatpush3.bf16.msra.mxu0 %v2189_v11 }
 0x82e   :  { %1988 = vmatprep.subr.bf16.mxu0 %v2485_v38 }
 0x831   :  { %1989 = vmatpush3.bf16.msra.mxu0 %v2191_v12 }
 0x832   :  { %1990 = vmatprep.subr.bf16.mxu0 %v2485_v38 }
 0x835   :  { %1991 = vmatpush3.bf16.msra.mxu0 %v2193_v59 }
 0x836   :  { %1992 = vmatprep.subr.bf16.mxu0 %v2485_v38 }
 0x839   :  { %1993 = vmatpush3.bf16.msra.mxu0 %v2195_v60 }
 0x83a   :  { %1994 = vmatprep.subr.bf16.mxu0 %v2485_v38 }
 0x83d   :  { %1995 = vmatpush3.bf16.msra.mxu0 %v2197_v13 }
 0x83e   :  { %1996 = vmatprep.subr.bf16.mxu0 %v2485_v38 }
 0x841   :  { %1997 = vmatpush3.bf16.msra.mxu0 %v2199_v15 }
 0x842   :  { %1998 = vmatprep.subr.bf16.mxu0 %v2485_v38 }
 0x845   :  { %1999 = vmatpush3.bf16.msra.mxu0 %v2201_v18 }
 0x8fb   :  { %v1472_v21 = vpop.f32.mrb[12].mxu0 }
 0x8fc   :  { %v1962_v22 = vpop.f32.mrb[13].mxu0  ;;  %v1473_v24 = vadd.f32 %v1472_v21, %v1389_v20 }
 0x8fd   :  { %v1475_v23 = vpop.f32.mrb[14].mxu0 }
 0x8fe   :  { %v1476_v25 = vadd.f32 %v1475_v23, %v1389_v20  ;;  %v1963_v26 = vpop.f32.mrb[15].mxu0 }
 0x900   :  { %v1479_v27 = vpack.c.bf16 %v1476_v25, %v1473_v24 }
 0x902   :  { %1981 = vmatmul.mubr.bf16.vlgmr.msra.gmra.mrb[20].mxu1 %v1479_v27  ;;  %2001 = vmatmul.mubr.bf16.vlgmr.msra.gmra.mrb[16].mxu0 %v1479_v27 }
 0x9d5   :  { %v1582_v30 = vpop.f32.mrb[20].mxu1  ;;  %v1691_v32 = vpop.f32.mrb[16].mxu0 }
 0x9d6   :  { %v1583_v33 = vadd.f32 %v1582_v30, %v1499_v29  ;;  %v1982_v34 = vpop.f32.mrb[21].mxu1  ;;  %v2002_v35 = vpop.f32.mrb[17].mxu0  ;;  %v1692_v53 = vadd.f32 %v1691_v32, %v1608_v48 }
 0x9d7   :  { %v1585_v36 = vpop.f32.mrb[22].mxu1  ;;  %v1694_v37 = vpop.f32.mrb[18].mxu0 }
 0x9d8   :  { %v1700_v63 = vmul.f32 %v1699_v31, %v1583_v33  ;;  %v1586_v38 = vadd.f32 %v1585_v36, %v1499_v29  ;;  %v1983_v2 = vpop.f32.mrb[23].mxu1  ;;  %v2003_v39 = vpop.f32.mrb[19].mxu0  ;;  %v1695_v57 = vadd.f32 %v1694_v37, %v1608_v48 }
 0x9da   :  { %v1869_v40 = vmul.f32 -1.442695, %v1700_v63  ;;  %v1701_v41 = vmul.f32 %v1699_v31, %v1586_v38 }
 0x9dc   :  { %2226 = vpow2.f32 %v1869_v40  ;;  %v1870_v42 = vmul.f32 -1.442695, %v1701_v41 }
 0x9de   :  { %2228 = vpow2.f32 %v1870_v42 }
 0x9e6   :  { %v2227_v43 = vpop.eup %2226 }
 0x9e7   :  { %v1708_v44 = vadd.f32 1.0, %v2227_v43 }
 0x9e8   :  { %v2229_v45 = vpop.eup %2228 }
 0x9e9   :  { %2230 = vrcp.f32 %v1708_v44  ;;  %v1709_v46 = vadd.f32 1.0, %v2229_v45 }
 0x9eb   :  { %2232 = vrcp.f32 %v1709_v46 }
 0x9f3   :  { %v2231_v49 = vpop.eup %2230 }
 0x9f4   :  { %v1714_v50 = vmul.f32 %v2231_v49, %v1583_v33 }
 0x9f5   :  { %v2233_v54 = vpop.eup %2232 }
 0x9f6   :  { %v1716_v55 = vmul.f32 %v1714_v50, %v1692_v53  ;;  %v1715_v56 = vmul.f32 %v2233_v54, %v1586_v38 }
 0x9f8   :  { %v1718_v58 = vadd.f32 %v1716_v55, %v2787_v8  ;;  %v1717_v61 = vmul.f32 %v1715_v56, %v1695_v57 }
 0x9fa   :  { %1720 = vst [vmem:[#allocation18] sm:$0xff] %v1718_v58  ;;  %v1719_v62 = vadd.f32 %v1717_v61, %v2790_v5 }
 0x9fc   :  { %1721 = vst [vmem:[#allocation18 + $0x8] sm:$0xff] %v1719_v62 }
 0x9fd   :  { %2443 = shalt.err (!%p2440_p6)
}
 0x9fe   :  { %s2444_s19 = scalar_lea.hbm %s2841_s11, 256 }
 0x9ff   :  { %p2445_p7 = scmp.ne.s32.totalorder %s2841_s11, %s2444_s19  ;;  %p2448_p8 = scmp.lt.u32.totalorder %s2444_s19, %s2841_s11 }
 0xa01   :  { %p2450_p9 = pnand %p2448_p8, %p2445_p7 }
 0xa03   :  { %2453 = shalt.err (!%p2450_p9)
}
 0xa04   :  { %1733 = dma.vmem_to_hbm [thread:$0]  %s1728_s14, 256, %s2841_s11, [#allocation5], %s2468_s29, %s2468_s29, %s2469_s30  }
 0xa05   :  { %2464 = dma.done.wait [#allocation5], 256  }
 0xa06   :  { %2465 = vsyncadd [#allocation5], 4294967040 }
 0xa07   :  { %1737 = vsyncpa [#allocation4], 1 }
 0xa08   :  { %1738 = vsyncpa [#allocation7], 1 }
 0xa09   :  { %1739 = vsyncpa [#allocation10], 1 }
 0xa0a   :  { %1740 = vsyncpa [#allocation13], 1 }
 0xa0b   :  { %1741 = vsyncpa [#allocation16], 1 }
 0xa0c   :  { %1742 = vsyncpa [#allocation5], 1 }

</bundles_post_ra>
